<compile_context>
chip_gen: v7x
topology: tpu7x:2x2x1
jax: 0.10.0
libtpu: 0.0.40
codegen_flags: <defaults>
</compile_context>

<pallas_src>
import functools

import jax
import jax.numpy as jnp
from jax.experimental import pallas as pl
from jax.experimental.pallas import tpu as pltpu


# ---------------------------------------------------------------------------
# Kernels
# ---------------------------------------------------------------------------

def _pool_kernel(x_ref, scale_ref, shift_ref, out_ref, acc_ref,
                 *, inv_hw: float, apply_affine: bool):
    """Spatial average pool over HW tiles (+ optional folded-BN scale/shift).

    grid = (n_b, n_k): batch axis "parallel" (megacore), HW axis is the
    pipelined reduction; acc_ref is an f32 VMEM accumulator per batch block.
    """
    k = pl.program_id(1)

    @pl.when(k == 0)
    def _():
        acc_ref[...] = jnp.zeros_like(acc_ref)

    # Partial spatial sum of this tile in f32; the VPU adds overlap with the
    # HBM DMA of the next x tile.
    acc_ref[...] += jnp.sum(x_ref[...].astype(jnp.float32), axis=1)

    @pl.when(k == pl.num_programs(1) - 1)
    def _():
        gf = acc_ref[...] * inv_hw
        if apply_affine:                 # eval bnneck: folded running-stat BN
            gf = gf * scale_ref[...] + shift_ref[...]
        out_ref[...] = gf.astype(out_ref.dtype)


def _bn_classifier_kernel(gf_ref, gamma_ref, beta_ref, w_ref, cls_ref, feat_sc,
                          *, apply_bn: bool, eps: float):
    """Train epilogue: batch-stat BN (bnneck) + bf16 classifier matmul.

    grid = (n_j,) over 128-aligned class tiles so the classifier weight is
    streamed instead of kept fully resident (double-buffered) in VMEM.
    """
    j = pl.program_id(0)

    @pl.when(j == 0)
    def _():
        gf = gf_ref[...]
        if apply_bn:
            mu = jnp.mean(gf, axis=0, keepdims=True)        # biased batch stats
            var = jnp.mean((gf - mu) * (gf - mu), axis=0, keepdims=True)
            feat = (gf - mu) * jax.lax.rsqrt(var + eps) * gamma_ref[...] + beta_ref[...]
        else:
            feat = gf
        feat_sc[...] = feat.astype(feat_sc.dtype)

    # bf16 inputs, f32 accumulation on the MXU.
    cls_ref[...] = jnp.dot(feat_sc[...], w_ref[...],
                           preferred_element_type=jnp.float32)


# ---------------------------------------------------------------------------
# Tiling / budget helpers
# ---------------------------------------------------------------------------

def _round_up(x, m):
    return (x + m - 1) // m * m


def _vmem_budgets():
    """(x double-buffer budget, vmem_limit cap), generation aware."""
    try:
        cap_bytes = int(pltpu.get_tpu_info().vmem_capacity_bytes)
    except Exception:
        cap_bytes = 64 << 20                       # conservative (v7x-sized)
    if cap_bytes >= (96 << 20):                    # v5e / v6e: 128 MiB VMEM
        return 48 << 20, 100 << 20
    return 24 << 20, 48 << 20                      # v7x: 64 MiB VMEM


def _vmem_limit(est_bytes, cap):
    """Scoped VMEM limit: never below the estimated requirement."""
    est_bytes = int(est_bytes)
    if est_bytes > cap:
        return est_bytes
    return int(min(max(est_bytes, 32 << 20), cap))


def _pick_batch_block(batch, channels, itemsize, budget):
    """Batch block: multiple of 8 dividing B, keeping n_b >= 2 when possible."""
    if batch % 8 != 0 or batch <= 8:
        # TODO(synk): padding B to a multiple of 8 would enable the megacore
        # split here, but padding copies the whole feature map in HBM (costs
        # more than the split saves); process the batch as one block instead.
        return batch
    best = 8
    for bb in range(8, batch // 2 + 1, 8):
        if bb > 32:
            break
        if batch % bb == 0 and 2 * bb * 16 * channels * itemsize <= budget:
            best = bb
    return best


def _pick_spatial_tile(batch_block, hw, channels, itemsize, budget):
    """Largest HW tile (multiple of 16, or full HW) whose double-buffered x
    block fits `budget`. Bigger tiles amortize the ~0.35us per-step overhead
    on the DMA-bound pooling."""
    cands = sorted({t for t in range(16, hw + 1, 16) if hw % t == 0} | {hw})
    fits = [t for t in cands
            if 2 * batch_block * t * channels * itemsize <= budget]
    if fits:
        return max(fits)
    return min(cands)      # best effort; vmem_limit is derived from the choice


def _pick_class_tile(n_padded, max_tn=1024):
    """Largest 128-multiple divisor of the padded class dim, capped at max_tn."""
    tn = 128
    t = 128
    while t <= min(n_padded, max_tn):
        if n_padded % t == 0:
            tn = t
        t += 128
    return tn


# ---------------------------------------------------------------------------
# pallas_call wrappers
# ---------------------------------------------------------------------------

def _run_pool(x_bhwc, *, scale=None, shift=None, apply_affine=False):
    """Global average pool (optionally fused with folded eval-BN). -> [B, C] f32."""
    B, H, W, C = x_bhwc.shape
    HW = H * W
    x = x_bhwc.reshape(B, HW, C)           # merging adjacent dims is free

    if scale is None:
        scale = jnp.ones((1, C), jnp.float32)
        shift = jnp.zeros((1, C), jnp.float32)
    scale = scale.reshape(1, C).astype(jnp.float32)
    shift = shift.reshape(1, C).astype(jnp.float32)

    x_budget, cap = _vmem_budgets()
    itemsize = x.dtype.itemsize
    bb = _pick_batch_block(B, C, itemsize, x_budget)
    n_b = B // bb
    t_hw = _pick_spatial_tile(bb, HW, C, itemsize, x_budget)
    n_k = HW // t_hw

    x_block_bytes = bb * t_hw * C * itemsize
    est = (2 * x_block_bytes            # double-buffered x tile
           + 2 * bb * C * 4             # output block (double-buffered)
           + 2 * 2 * 2 * C * 4          # scale + shift
           + bb * C * 4                 # accumulator scratch
           + (4 << 20))                 # margin

    kernel = functools.partial(_pool_kernel, inv_hw=1.0 / HW,
                               apply_affine=apply_affine)

    out = pl.pallas_call(
        kernel,
        out_shape=jax.ShapeDtypeStruct((B, C), jnp.float32),
        grid=(n_b, n_k),
        in_specs=[
            pl.BlockSpec((bb, t_hw, C), lambda b, k: (b, k, 0)),
            pl.BlockSpec((1, C), lambda b, k: (0, 0)),
            pl.BlockSpec((1, C), lambda b, k: (0, 0)),
        ],
        out_specs=pl.BlockSpec((bb, C), lambda b, k: (b, 0)),
        scratch_shapes=[pltpu.VMEM((bb, C), jnp.float32)],
        compiler_params=pltpu.CompilerParams(
            dimension_semantics=("parallel", "arbitrary"),
            vmem_limit_bytes=_vmem_limit(est, cap)),
    )(x, scale, shift)
    return out


def _run_bn_classifier(gf, params, *, apply_bn=True, eps=1e-5):
    """Batch-stat BN (bnneck) + classifier logits. gf: [B, C] f32 -> [B, num_classes]."""
    B, C = gf.shape
    w_t = params["w_t"]                       # [C, Np] bf16, Np multiple of 128
    Np = w_t.shape[1]
    tn = _pick_class_tile(Np)
    n_j = Np // tn

    _, cap = _vmem_budgets()
    est = (2 * B * C * 4                      # gf (grid-invariant, double-buffered)
           + 2 * 2 * C * 4                    # gamma + beta
           + 2 * C * tn * w_t.dtype.itemsize  # streamed weight tile
           + 2 * B * tn * 4                   # cls output tile
           + B * C * 2                        # bf16 feat scratch
           + (4 << 20))

    kernel = functools.partial(_bn_classifier_kernel, apply_bn=apply_bn, eps=eps)

    cls = pl.pallas_call(
        kernel,
        out_shape=jax.ShapeDtypeStruct((B, Np), jnp.float32),
        grid=(n_j,),
        in_specs=[
            pl.BlockSpec((B, C), lambda j: (0, 0)),
            pl.BlockSpec((1, C), lambda j: (0, 0)),
            pl.BlockSpec((1, C), lambda j: (0, 0)),
            pl.BlockSpec((C, tn), lambda j: (0, j)),
        ],
        out_specs=pl.BlockSpec((B, tn), lambda j: (0, j)),
        scratch_shapes=[pltpu.VMEM((B, C), jnp.bfloat16)],
        compiler_params=pltpu.CompilerParams(
            dimension_semantics=("arbitrary",),
            vmem_limit_bytes=_vmem_limit(est, cap)),
    )(gf, params["gamma"], params["beta"], w_t)
    return cls[:, :params["num_classes"]]


# ---------------------------------------------------------------------------
# Module-level forward + params
# ---------------------------------------------------------------------------

def backbone_forward(x_feat_bhwc, params, *, training=False,
                     neck="bnneck", neck_feat="after", eps=1e-5):
    """Mirrors Backbone.forward starting from the output of self.base
    (feature map given channels-last, [B, H, W, C])."""
    if training:
        # TODO(synk): cos_layer (arcface) path and BatchNorm running-stat
        # updates are not reproduced; forward outputs match the default cfg.
        global_feat = _run_pool(x_feat_bhwc)                          # [B, C]
        cls_score = _run_bn_classifier(global_feat, params,
                                       apply_bn=(neck != "no"), eps=eps)
        return cls_score, global_feat

    # Eval: emit only the tensor the caller keeps (review item: skip dead outputs).
    if neck != "bnneck" or neck_feat != "after":
        return _run_pool(x_feat_bhwc)                                 # global_feat
    # bnneck + 'after': fold running-stat BN into a single scale/shift.
    scale = params["gamma"] * jax.lax.rsqrt(params["running_var"] + eps)
    shift = params["beta"] - params["running_mean"] * scale
    return _run_pool(x_feat_bhwc, scale=scale, shift=shift, apply_affine=True)


def init_params(key, in_planes, num_classes):
    """Deterministic init matching Backbone.__init__."""
    # classifier: weights_init_classifier -> normal(std=0.001), bias=False
    w = 0.001 * jax.random.normal(key, (num_classes, in_planes), jnp.float32)
    n_pad = _round_up(num_classes, 128)          # lane-dense classifier output
    w_t = jnp.zeros((in_planes, n_pad), jnp.float32).at[:, :num_classes].set(w.T)
    # bottleneck BN: weights_init_kaiming -> gamma=1, beta=0; default running stats
    return {
        "num_classes": num_classes,
        "w_t": w_t.astype(jnp.bfloat16),                     # [C, Np]
        "gamma": jnp.ones((1, in_planes), jnp.float32),
        "beta": jnp.zeros((1, in_planes), jnp.float32),
        "running_mean": jnp.zeros((1, in_planes), jnp.float32),
        "running_var": jnp.ones((1, in_planes), jnp.float32),
    }


# ---------------------------------------------------------------------------
# Pure-JAX reference (same numerics: f32 pooling/BN, bf16 classifier matmul)
# ---------------------------------------------------------------------------

def _reference(x_bhwc, params, training, eps=1e-5):
    gf = jnp.mean(x_bhwc.astype(jnp.float32), axis=(1, 2))            # [B, C]
    if training:
        mu = jnp.mean(gf, axis=0, keepdims=True)
        var = jnp.mean((gf - mu) ** 2, axis=0, keepdims=True)
    else:
        mu, var = params["running_mean"], params["running_var"]
    feat = (gf - mu) * jax.lax.rsqrt(var + eps) * params["gamma"] + params["beta"]
    cls = jnp.dot(feat.astype(jnp.bfloat16), params["w_t"],
                  preferred_element_type=jnp.float32)[:, :params["num_classes"]]
    return gf, feat, cls


if __name__ == "__main__":
    key = jax.random.PRNGKey(0)
    k_x, k_w = jax.random.split(key)

    B, H, W, C = 2, 8, 8, 2048              # C = self.in_planes = 2048
    NUM_CLASSES = 16

    # Stand-in for self.base(x) output (ResNet50 trunk features), channels-last,
    # stored in bf16 to halve HBM traffic of the pooling read.
    x_feat = jax.random.normal(k_x, (B, H, W, C), jnp.float32).astype(jnp.bfloat16)
    params = init_params(k_w, C, NUM_CLASSES)

    # Eval path: neck='bnneck', neck_feat='after' -> returns bnneck feature.
    feat = backbone_forward(x_feat, params, training=False,
                            neck="bnneck", neck_feat="after")
    # Eval path: neck_feat='before' -> returns global_feat (affine skipped).
    gf_eval = backbone_forward(x_feat, params, training=False,
                               neck="bnneck", neck_feat="before")
    # Training path: returns (cls_score, global_feat).
    cls_score, global_feat = backbone_forward(x_feat, params, training=True)
    jax.block_until_ready((feat, gf_eval, cls_score, global_feat))

    # Verify against the pure-JAX reference.
    ref_gf_e, ref_feat_e, _ = _reference(x_feat, params, training=False)
    ref_gf_t, _, ref_cls_t = _reference(x_feat, params, training=True)
    assert jnp.allclose(feat, ref_feat_e, atol=1e-4, rtol=1e-4)
    assert jnp.allclose(gf_eval, ref_gf_e, atol=1e-4, rtol=1e-4)
    assert jnp.allclose(global_feat, ref_gf_t, atol=1e-4, rtol=1e-4)
    assert jnp.allclose(cls_score, ref_cls_t, atol=2e-3, rtol=2e-3)

    print("KERNEL_OK")
</pallas_src>

<mosaic_0001>
module attributes {stable_mosaic.version = 11 : i64} {
  func.func @_pool_kernel(%arg0: i32, %arg1: i32, %arg2: memref<2x64x2048xbf16, #tpu.memory_space<vmem>>, %arg3: memref<1x2048xf32, #tpu.memory_space<vmem>>, %arg4: memref<1x2048xf32, #tpu.memory_space<vmem>>, %arg5: memref<2x2048xf32, #tpu.memory_space<vmem>>, %arg6: memref<2x2048xf32, #tpu.memory_space<vmem>>) attributes {dimension_semantics = [#tpu.dimension_semantics<parallel>, #tpu.dimension_semantics<arbitrary>], iteration_bounds = array<i64: 1, 1>, scalar_prefetch = 0 : i64, scratch_operands = 1 : i64, tpu.core_type = #tpu.core_type<tc>, window_params = [{transform_indices = @transform_0, window_bounds = array<i64: 2, 64, 2048>}, {pipeline_mode = #tpu.pipeline_mode<synchronous>, transform_indices = @transform_1, window_bounds = array<i64: 1, 2048>}, {pipeline_mode = #tpu.pipeline_mode<synchronous>, transform_indices = @transform_2, window_bounds = array<i64: 1, 2048>}, {transform_indices = @transform_3, window_bounds = array<i64: 2, 2048>}]} {
    %c0_i32 = arith.constant 0 : i32
    %0 = arith.cmpi eq, %arg1, %c0_i32 : i32
    %1 = arith.extui %0 : i1 to i32
    %c0_i32_0 = arith.constant 0 : i32
    %2 = arith.cmpi ne, %1, %c0_i32_0 : i32
    scf.if %2 {
      %cst_9 = arith.constant 0.000000e+00 : f32
      %12 = vector.broadcast %cst_9 : f32 to vector<2x2048xf32>
      %c0_10 = arith.constant 0 : index
      %c0_11 = arith.constant 0 : index
      %13 = vector.load %arg6[%c0_10, %c0_11] : memref<2x2048xf32, #tpu.memory_space<vmem>>, vector<2x2048xf32>
      tpu.vector_store %arg6[%c0_10, %c0_11], %12 {strides = array<i32>} : memref<2x2048xf32, #tpu.memory_space<vmem>>, vector<2x2048xf32>,
    } else {
    }
    %c0 = arith.constant 0 : index
    %c0_1 = arith.constant 0 : index
    %3 = vector.load %arg6[%c0, %c0_1] : memref<2x2048xf32, #tpu.memory_space<vmem>>, vector<2x2048xf32>
    %c0_2 = arith.constant 0 : index
    %c0_3 = arith.constant 0 : index
    %c0_4 = arith.constant 0 : index
    %4 = vector.load %arg2[%c0_2, %c0_3, %c0_4] : memref<2x64x2048xbf16, #tpu.memory_space<vmem>>, vector<2x64x2048xbf16>
    %5 = arith.extf %4 : vector<2x64x2048xbf16> to vector<2x64x2048xf32>
    %cst = arith.constant dense<0.000000e+00> : vector<2x2048xf32>
    %6 = vector.multi_reduction <add>, %5, %cst [1] : vector<2x64x2048xf32> to vector<2x2048xf32>
    %7 = arith.addf %3, %6 : vector<2x2048xf32>
    %c0_5 = arith.constant 0 : index
    %c0_6 = arith.constant 0 : index
    %8 = vector.load %arg6[%c0_5, %c0_6] : memref<2x2048xf32, #tpu.memory_space<vmem>>, vector<2x2048xf32>
    tpu.vector_store %arg6[%c0_5, %c0_6], %7 {strides = array<i32>} : memref<2x2048xf32, #tpu.memory_space<vmem>>, vector<2x2048xf32>,
    %c0_i32_7 = arith.constant 0 : i32
    %9 = arith.cmpi eq, %arg1, %c0_i32_7 : i32
    %10 = arith.extui %9 : i1 to i32
    %c0_i32_8 = arith.constant 0 : i32
    %11 = arith.cmpi ne, %10, %c0_i32_8 : i32
    scf.if %11 {
      %c0_9 = arith.constant 0 : index
      %c0_10 = arith.constant 0 : index
      %12 = vector.load %arg6[%c0_9, %c0_10] : memref<2x2048xf32, #tpu.memory_space<vmem>>, vector<2x2048xf32>
      %cst_11 = arith.constant 1.562500e-02 : f32
      %13 = vector.broadcast %cst_11 : f32 to vector<2x2048xf32>
      %14 = arith.mulf %12, %13 : vector<2x2048xf32>
      %c0_12 = arith.constant 0 : index
      %c0_13 = arith.constant 0 : index
      %15 = vector.load %arg3[%c0_12, %c0_13] : memref<1x2048xf32, #tpu.memory_space<vmem>>, vector<1x2048xf32>
      %16 = vector.broadcast %15 : vector<1x2048xf32> to vector<2x2048xf32>
      %17 = arith.mulf %14, %16 : vector<2x2048xf32>
      %c0_14 = arith.constant 0 : index
      %c0_15 = arith.constant 0 : index
      %18 = vector.load %arg4[%c0_14, %c0_15] : memref<1x2048xf32, #tpu.memory_space<vmem>>, vector<1x2048xf32>
      %19 = vector.broadcast %18 : vector<1x2048xf32> to vector<2x2048xf32>
      %20 = arith.addf %17, %19 : vector<2x2048xf32>
      %c0_16 = arith.constant 0 : index
      %c0_17 = arith.constant 0 : index
      %21 = vector.load %arg5[%c0_16, %c0_17] : memref<2x2048xf32, #tpu.memory_space<vmem>>, vector<2x2048xf32>
      tpu.vector_store %arg5[%c0_16, %c0_17], %20 {strides = array<i32>} : memref<2x2048xf32, #tpu.memory_space<vmem>>, vector<2x2048xf32>,
    } else {
    }
    return
  }
  func.func @transform_0(%arg0: i32, %arg1: i32) -> (i32, i32, i32) {
    %c0_i32 = arith.constant 0 : i32
    %c0_i32_0 = arith.constant 0 : i32
    return %arg0, %arg1, %c0_i32 : i32, i32, i32
  }
  func.func @transform_1(%arg0: i32, %arg1: i32) -> (i32, i32) {
    %c0_i32 = arith.constant 0 : i32
    %c0_i32_0 = arith.constant 0 : i32
    %c0_i32_1 = arith.constant 0 : i32
    return %c0_i32, %c0_i32_0 : i32, i32
  }
  func.func @transform_2(%arg0: i32, %arg1: i32) -> (i32, i32) {
    %c0_i32 = arith.constant 0 : i32
    %c0_i32_0 = arith.constant 0 : i32
    %c0_i32_1 = arith.constant 0 : i32
    return %c0_i32, %c0_i32_0 : i32, i32
  }
  func.func @transform_3(%arg0: i32, %arg1: i32) -> (i32, i32) {
    %c0_i32 = arith.constant 0 : i32
    %c0_i32_0 = arith.constant 0 : i32
    return %arg0, %c0_i32 : i32, i32
  }
}

</mosaic_0001>

<bundles_post_ra>
// kernel: tpu_custom_call.1
= control target key start
LH: loop header
LB: loop body
LE: loop exit
PB: predicated region body
PF: predicated region fallthrough
CT: control target
= control target key end

     0   :  { %8 = vsyncpa [#allocation4], 0  ;;  %s2825_s0 = inlined_call_operand.hbm [shape: bf16[2,64,2048], index: 0, kind: input, shape index: {}]   ;;  %s2826_s1 = inlined_call_operand.hbm [shape: f32[1,2048], index: 1, kind: input, shape index: {}]   ;;  %s2827_s2 = inlined_call_operand.hbm [shape: f32[1,2048], index: 2, kind: input, shape index: {}]   ;;  %s2828_s3 = inlined_call_operand.hbm [shape: f32[2,2048], index: 3, kind: output, shape index: {}]  }
   0x1   :  { %9 = vsyncpa [#allocation7], 0 }
   0x2   :  { %10 = vsyncpa [#allocation5], 0  ;;  %s1498_s12 = smov [#allocation6]   ;;  %s1499_s14 = smov [#allocation3]  }
   0x3   :  { %s29_s13 = sshll.u32 %s1498_s12, 4  ;;  %s16_s15 = sshll.u32 %s1499_s14, 4  ;;  %s30_s13 = int_to_ptr.vmem [resolvable:$true] %s29_s13  ;;  %s1525_s15 = int_to_ptr.vmem [resolvable:$true] %s16_s15 }
   0x4   :  { %s1404_s18 = scalar_lea.hbm %s2826_s1, 256 }
   0x5   :  { %p1405_p0 = scmp.ne.s32.totalorder %s2826_s1, %s1404_s18  ;;  %p1408_p1 = scmp.lt.u32.totalorder %s1404_s18, %s2826_s1 }
   0x7   :  { %p1410_p2 = pnand %p1408_p1, %p1405_p0 }
   0x9   :  { %1413 = shalt.err (!%p1410_p2)
}
   0xa   :  { %s1414_s23 = scalar_lea.vmem %s30_s13, 256  ;;  %p1419_p4 = scmp.lt.s32.totalorder %s30_s13, %s30_s13 }
   0xb   :  { %p1415_p3 = scmp.ne.s32.totalorder %s30_s13, %s1414_s23  ;;  %p1420_p5 = scmp.lt.s32.totalorder %s1414_s23, %s1414_s23 }
   0xd   :  { %p1421_p6 = por %p1420_p5, %p1419_p4 }
   0xf   :  { %p1422_p7 = pnand %p1421_p6, %p1415_p3 }
  0x11   :  { %1425 = shalt.err (!%p1422_p7)
}
  0x12   :  { %32 = dma.hbm_to_vmem [thread:$0]  %s2826_s1, 256, %s30_s13, [#allocation7]  }
  0x13   :  { %s1426_s28 = scalar_lea.hbm %s2825_s0, 16384 }
  0x14   :  { %p1427_p8 = scmp.ne.s32.totalorder %s2825_s0, %s1426_s28  ;;  %p1430_p9 = scmp.lt.u32.totalorder %s1426_s28, %s2825_s0 }
  0x16   :  { %p1432_p10 = pnand %p1430_p9, %p1427_p8 }
  0x18   :  { %1435 = shalt.err (!%p1432_p10)
}
  0x19   :  { %s1436_s6 = scalar_lea.vmem %s1525_s15, 16384  ;;  %p1441_p12 = scmp.lt.s32.totalorder %s1525_s15, %s1525_s15 }
  0x1a   :  { %p1437_p11 = scmp.ne.s32.totalorder %s1525_s15, %s1436_s6  ;;  %p1442_p13 = scmp.lt.s32.totalorder %s1436_s6, %s1436_s6 }
  0x1c   :  { %p1443_p0 = por %p1442_p13, %p1441_p12 }
  0x1e   :  { %p1444_p1 = pnand %p1443_p0, %p1437_p11 }
  0x20   :  { %1447 = shalt.err (!%p1444_p1)
}
  0x21   :  { %s1500_s1 = smov 1024   ;;  %s1501_s7 = smov 64  }
  0x22   :  { %22 = dma.hbm_to_vmem [thread:$0]  %s2825_s0, 16384, %s1525_s15, [#allocation4], %s1500_s1, %s1500_s1, %s1501_s7  }
  0x23   :  { %s1502_s10 = smov [#allocation8]   ;;  %s1448_s14 = scalar_lea.hbm %s2827_s2, 256 }
  0x24   :  { %s39_s11 = sshll.u32 %s1502_s10, 4  ;;  %p1449_p2 = scmp.ne.s32.totalorder %s2827_s2, %s1448_s14  ;;  %s40_s11 = int_to_ptr.vmem [resolvable:$true] %s39_s11 }
  0x25   :  { %p1452_p3 = scmp.lt.u32.totalorder %s1448_s14, %s2827_s2 }
  0x27   :  { %p1454_p4 = pnand %p1452_p3, %p1449_p2 }
  0x29   :  { %1457 = shalt.err (!%p1454_p4)
}
  0x2a   :  { %s1458_s20 = scalar_lea.vmem %s40_s11, 256  ;;  %p1463_p6 = scmp.lt.s32.totalorder %s40_s11, %s40_s11 }
  0x2b   :  { %p1459_p5 = scmp.ne.s32.totalorder %s40_s11, %s1458_s20  ;;  %p1464_p7 = scmp.lt.s32.totalorder %s1458_s20, %s1458_s20 }
  0x2d   :  { %p1465_p8 = por %p1464_p7, %p1463_p6 }
  0x2f   :  { %p1466_p9 = pnand %p1465_p8, %p1459_p5 }
  0x31   :  { %1469 = shalt.err (!%p1466_p9)
}
  0x32   :  { %42 = dma.hbm_to_vmem [thread:$0]  %s2827_s2, 256, %s40_s11, [#allocation7]  }
  0x33   :  { %1492 = dma.done.wait [#allocation4], 16384  }
  0x34   :  { %1493 = vsyncadd [#allocation4], 4294950912 }
  0x35   :  { %1494 = dma.done.wait [#allocation7], 512  }
  0x36   :  { %1495 = vsyncadd [#allocation7], 4294966784  ;;  %v1568_v0 = vld [vmem:[#allocation3] sm:$0xff]  ;;  %v1570_v1 = vld [vmem:[#allocation3 + $0x8] sm:$0xff]  ;;  %vm1037_vm0 = vcmask 1041409   ;;  %vm1039_vm1 = vcmask 1043459  }
  0x37   :  { %v1572_v2 = vld [vmem:[#allocation3 + $0x10] sm:$0xff]  ;;  %v1574_v3 = vld [vmem:[#allocation3 + $0x18] sm:$0xff]  ;;  %v1576_v4 = vld [vmem:[#allocation3 + $0x20] sm:$0xff]  ;;  %vm1041_vm2 = vcmask 1045509   ;;  %vm1043_vm3 = vcmask 1047559   ;;  %s1504_s2 = smov [#allocation9]  }
  0x38   :  { %v1578_v5 = vld [vmem:[#allocation3 + $0x28] sm:$0xff]  ;;  %v1582_v8 = vld [vmem:[#allocation3 + $0x30] sm:$0xff]  ;;  %v1584_v9 = vld [vmem:[#allocation3 + $0x38] sm:$0xff]  ;;  %s1387_s21 = sshll.u32 %s1504_s2, 4  ;;  %s1388_s21 = int_to_ptr.vmem [resolvable:$true] %s1387_s21 }
  0x39   :  { %v1586_v10 = vld [vmem:[#allocation3 + $0x40] sm:$0xff]  ;;  %v1592_v15 = vld [vmem:[#allocation3 + $0x48] sm:$0xff]  ;;  %v1594_v16 = vld [vmem:[#allocation3 + $0x50] sm:$0xff]  ;;  %s1470_s22 = scalar_lea.vmem %s1388_s21, 512  ;;  %p1475_p11 = scmp.lt.s32.totalorder %s1388_s21, %s1388_s21 }
  0x3a   :  { %v1600_v21 = vld [vmem:[#allocation3 + $0x58] sm:$0xff]  ;;  %v1602_v22 = vld [vmem:[#allocation3 + $0x60] sm:$0xff]  ;;  %v1608_v27 = vld [vmem:[#allocation3 + $0x68] sm:$0xff]  ;;  %p1471_p10 = scmp.ne.s32.totalorder %s1388_s21, %s1470_s22  ;;  %p1476_p12 = scmp.lt.s32.totalorder %s1470_s22, %s1470_s22 }
  0x3b   :  { %v1610_v28 = vld [vmem:[#allocation3 + $0x70] sm:$0xff]  ;;  %v1616_v33 = vld [vmem:[#allocation3 + $0x78] sm:$0xff]  ;;  %v1618_v34 = vld [vmem:[#allocation3 + $0x80] sm:$0xff] }
  0x3c   :  { %v1624_v39 = vld [vmem:[#allocation3 + $0x88] sm:$0xff]  ;;  %v1626_v40 = vld [vmem:[#allocation3 + $0x90] sm:$0xff]  ;;  %v1632_v45 = vld [vmem:[#allocation3 + $0x98] sm:$0xff]  ;;  %p1477_p13 = por %p1476_p12, %p1475_p11 }
  0x3d   :  { %v1634_v46 = vld [vmem:[#allocation3 + $0xa0] sm:$0xff]  ;;  %v1640_v51 = vld [vmem:[#allocation3 + $0xa8] sm:$0xff]  ;;  %v1642_v52 = vld [vmem:[#allocation3 + $0xb0] sm:$0xff] }
  0x3e   :  { %v1648_v57 = vld [vmem:[#allocation3 + $0xb8] sm:$0xff]  ;;  %v1650_v58 = vld [vmem:[#allocation3 + $0xc0] sm:$0xff]  ;;  %v1656_v63 = vld [vmem:[#allocation3 + $0xc8] sm:$0xff]  ;;  %p1478_p0 = pnand %p1477_p13, %p1471_p10 }
  0x3f   :  { %v1658_v30 = vld [vmem:[#allocation3 + $0xd0] sm:$0xff]  ;;  %v1664_v26 = vld [vmem:[#allocation3 + $0xd8] sm:$0xff]  ;;  %v1666_v49 = vld [vmem:[#allocation3 + $0xe0] sm:$0xff] }
  0x40   :  { %v1672_v23 = vld [vmem:[#allocation3 + $0xe8] sm:$0xff]  ;;  %v1674_v44 = vld [vmem:[#allocation3 + $0xf0] sm:$0xff]  ;;  %v1680_v19 = vld [vmem:[#allocation3 + $0xf8] sm:$0xff] }
  0x41   :  { %2985 = vst [vmem:[#allocation13_spill] sm:$0xff] %v1672_v23  ;;  %2986 = vst [vmem:[#allocation14_spill] sm:$0xff] %v1674_v44  ;;  %v1682_v25 = vld [vmem:[#allocation3 + $0x100] sm:$0xff]  ;;  %v1688_v54 = vld [vmem:[#allocation3 + $0x108] sm:$0xff] }
  0x42   :  { %2987 = vst [vmem:[#allocation15_spill] sm:$0xff] %v1680_v19  ;;  %v1690_v29 = vld [vmem:[#allocation3 + $0x110] sm:$0xff]  ;;  %v1696_v61 = vld [vmem:[#allocation3 + $0x118] sm:$0xff]  ;;  %v1698_v24 = vld [vmem:[#allocation3 + $0x120] sm:$0xff] }
  0x43   :  { %2988 = vst [vmem:[#allocation16_spill] sm:$0xff] %v1698_v24  ;;  %v1704_v59 = vld [vmem:[#allocation3 + $0x128] sm:$0xff]  ;;  %v1706_v50 = vld [vmem:[#allocation3 + $0x130] sm:$0xff]  ;;  %v1712_v55 = vld [vmem:[#allocation3 + $0x138] sm:$0xff] }
  0x44   :  { %2989 = vst [vmem:[#allocation17_spill] sm:$0xff] %v1704_v59  ;;  %2990 = vst [vmem:[#allocation18_spill] sm:$0xff] %v1706_v50  ;;  %v1714_v48 = vld [vmem:[#allocation3 + $0x140] sm:$0xff]  ;;  %v1720_v18 = vld [vmem:[#allocation3 + $0x148] sm:$0xff] }
  0x45   :  { %2991 = vst [vmem:[#allocation19_spill] sm:$0xff] %v1712_v55  ;;  %v1722_v20 = vld [vmem:[#allocation3 + $0x150] sm:$0xff]  ;;  %v1728_v17 = vld [vmem:[#allocation3 + $0x158] sm:$0xff]  ;;  %v1730_v47 = vld [vmem:[#allocation3 + $0x160] sm:$0xff] }
  0x46   :  { %2992 = vst [vmem:[#allocation20_spill] sm:$0xff] %v1730_v47  ;;  %v1736_v14 = vld [vmem:[#allocation3 + $0x168] sm:$0xff]  ;;  %v1738_v62 = vld [vmem:[#allocation3 + $0x170] sm:$0xff]  ;;  %v1744_v13 = vld [vmem:[#allocation3 + $0x178] sm:$0xff] }
  0x47   :  { %2993 = vst [vmem:[#allocation21_spill] sm:$0xff] %v1736_v14  ;;  %2994 = vst [vmem:[#allocation22_spill] sm:$0xff] %v1738_v62  ;;  %v1746_v53 = vld [vmem:[#allocation3 + $0x180] sm:$0xff]  ;;  %v1752_v12 = vld [vmem:[#allocation3 + $0x188] sm:$0xff] }
  0x48   :  { %2995 = vst [vmem:[#allocation23_spill] sm:$0xff] %v1744_v13  ;;  %v1754_v43 = vld [vmem:[#allocation3 + $0x190] sm:$0xff]  ;;  %v1760_v11 = vld [vmem:[#allocation3 + $0x198] sm:$0xff]  ;;  %v1762_v60 = vld [vmem:[#allocation3 + $0x1a0] sm:$0xff] }
  0x49   :  { %2996 = vst [vmem:[#allocation24_spill] sm:$0xff] %v1762_v60  ;;  %v1768_v7 = vld [vmem:[#allocation3 + $0x1a8] sm:$0xff]  ;;  %v1770_v41 = vld [vmem:[#allocation3 + $0x1b0] sm:$0xff]  ;;  %v1776_v6 = vld [vmem:[#allocation3 + $0x1b8] sm:$0xff] }
  0x4a   :  { %2997 = vst [vmem:[#allocation25_spill] sm:$0xff] %v1768_v7  ;;  %2998 = vst [vmem:[#allocation26_spill] sm:$0xff] %v1770_v41  ;;  %v1778_v42 = vld [vmem:[#allocation3 + $0x1c0] sm:$0xff]  ;;  %v1784_v14 = vld [vmem:[#allocation3 + $0x1c8] sm:$0xff] }
  0x4b   :  { %2999 = vst [vmem:[#allocation27_spill] sm:$0xff] %v1776_v6  ;;  %v1786_v56 = vld [vmem:[#allocation3 + $0x1d0] sm:$0xff]  ;;  %v1792_v47 = vld [vmem:[#allocation3 + $0x1d8] sm:$0xff]  ;;  %v1794_v38 = vld [vmem:[#allocation3 + $0x1e0] sm:$0xff] }
  0x4c   :  { %3000 = vst [vmem:[#allocation28_spill] sm:$0xff] %v1794_v38  ;;  %v1800_v50 = vld [vmem:[#allocation3 + $0x1e8] sm:$0xff]  ;;  %v1802_v35 = vld [vmem:[#allocation3 + $0x1f0] sm:$0xff]  ;;  %v1808_v59 = vld [vmem:[#allocation3 + $0x1f8] sm:$0xff] }
  0x4d   :  { %3001 = vst [vmem:[#allocation29_spill] sm:$0xff] %v1800_v50  ;;  %3002 = vst [vmem:[#allocation30_spill] sm:$0xff] %v1802_v35  ;;  %v1810_v36 = vld [vmem:[#allocation3 + $0x200] sm:$0xff]  ;;  %v1816_v7 = vld [vmem:[#allocation3 + $0x208] sm:$0xff] }
  0x4e   :  { %3003 = vst [vmem:[#allocation31_spill] sm:$0xff] %v1808_v59  ;;  %3004 = vst [vmem:[#allocation32_spill] sm:$0xff] %v1810_v36  ;;  %v1818_v37 = vld [vmem:[#allocation3 + $0x210] sm:$0xff]  ;;  %v1824_v24 = vld [vmem:[#allocation3 + $0x218] sm:$0xff] }
  0x4f   :  { %3005 = vst [vmem:[#allocation33_spill] sm:$0xff] %v1816_v7  ;;  %3006 = vst [vmem:[#allocation34_spill] sm:$0xff] %v1818_v37  ;;  %v1826_v32 = vld [vmem:[#allocation3 + $0x220] sm:$0xff]  ;;  %v1832_v44 = vld [vmem:[#allocation3 + $0x228] sm:$0xff] }
  0x50   :  { %3007 = vst [vmem:[#allocation35_spill] sm:$0xff] %v1824_v24  ;;  %3008 = vst [vmem:[#allocation36_spill] sm:$0xff] %v1826_v32  ;;  %v1834_v13 = vld [vmem:[#allocation3 + $0x230] sm:$0xff]  ;;  %v1840_v23 = vld [vmem:[#allocation3 + $0x238] sm:$0xff] }
  0x51   :  { %3009 = vst [vmem:[#allocation37_spill] sm:$0xff] %v1832_v44  ;;  %3010 = vst [vmem:[#allocation38_spill] sm:$0xff] %v1834_v13  ;;  %v1842_v62 = vld [vmem:[#allocation3 + $0x240] sm:$0xff]  ;;  %v1848_v50 = vld [vmem:[#allocation3 + $0x248] sm:$0xff] }
  0x52   :  { %3011 = vst [vmem:[#allocation39_spill] sm:$0xff] %v1840_v23  ;;  %3012 = vst [vmem:[#allocation40_spill] sm:$0xff] %v1842_v62  ;;  %v1850_v31 = vld [vmem:[#allocation3 + $0x250] sm:$0xff]  ;;  %v1856_v59 = vld [vmem:[#allocation3 + $0x258] sm:$0xff] }
  0x53   :  { %3013 = vst [vmem:[#allocation41_spill] sm:$0xff] %v1848_v50  ;;  %3014 = vst [vmem:[#allocation42_spill] sm:$0xff] %v1850_v31  ;;  %v1858_v55 = vld [vmem:[#allocation3 + $0x260] sm:$0xff]  ;;  %v1864_v7 = vld [vmem:[#allocation3 + $0x268] sm:$0xff] }
  0x54   :  { %3015 = vst [vmem:[#allocation43_spill] sm:$0xff] %v1856_v59  ;;  %3016 = vst [vmem:[#allocation44_spill] sm:$0xff] %v1858_v55  ;;  %v1866_v60 = vld [vmem:[#allocation3 + $0x270] sm:$0xff]  ;;  %v1872_v24 = vld [vmem:[#allocation3 + $0x278] sm:$0xff] }
  0x55   :  { %3017 = vst [vmem:[#allocation45_spill] sm:$0xff] %v1864_v7  ;;  %3018 = vst [vmem:[#allocation46_spill] sm:$0xff] %v1866_v60  ;;  %v1874_v41 = vld [vmem:[#allocation3 + $0x280] sm:$0xff]  ;;  %v1880_v44 = vld [vmem:[#allocation3 + $0x288] sm:$0xff] }
  0x56   :  { %3019 = vst [vmem:[#allocation47_spill] sm:$0xff] %v1872_v24  ;;  %3020 = vst [vmem:[#allocation48_spill] sm:$0xff] %v1874_v41  ;;  %v1882_v6 = vld [vmem:[#allocation3 + $0x290] sm:$0xff]  ;;  %v1888_v62 = vld [vmem:[#allocation3 + $0x298] sm:$0xff] }
  0x57   :  { %3021 = vst [vmem:[#allocation49_spill] sm:$0xff] %v1880_v44  ;;  %3022 = vst [vmem:[#allocation50_spill] sm:$0xff] %v1882_v6  ;;  %v1890_v19 = vld [vmem:[#allocation3 + $0x2a0] sm:$0xff]  ;;  %v1896_v50 = vld [vmem:[#allocation3 + $0x2a8] sm:$0xff] }
  0x58   :  { %3023 = vst [vmem:[#allocation51_spill] sm:$0xff] %v1888_v62  ;;  %3024 = vst [vmem:[#allocation52_spill] sm:$0xff] %v1890_v19  ;;  %v1898_v36 = vld [vmem:[#allocation3 + $0x2b0] sm:$0xff]  ;;  %v1904_v59 = vld [vmem:[#allocation3 + $0x2b8] sm:$0xff] }
  0x59   :  { %3025 = vst [vmem:[#allocation53_spill] sm:$0xff] %v1896_v50  ;;  %3026 = vst [vmem:[#allocation54_spill] sm:$0xff] %v1898_v36  ;;  %v1906_v35 = vld [vmem:[#allocation3 + $0x2c0] sm:$0xff]  ;;  %v1912_v7 = vld [vmem:[#allocation3 + $0x2c8] sm:$0xff] }
  0x5a   :  { %3027 = vst [vmem:[#allocation55_spill] sm:$0xff] %v1904_v59  ;;  %3028 = vst [vmem:[#allocation56_spill] sm:$0xff] %v1906_v35  ;;  %v1914_v38 = vld [vmem:[#allocation3 + $0x2d0] sm:$0xff]  ;;  %v1920_v41 = vld [vmem:[#allocation3 + $0x2d8] sm:$0xff] }
  0x5b   :  { %3029 = vst [vmem:[#allocation57_spill] sm:$0xff] %v1912_v7  ;;  %3030 = vst [vmem:[#allocation58_spill] sm:$0xff] %v1914_v38  ;;  %v1922_v37 = vld [vmem:[#allocation3 + $0x2e0] sm:$0xff]  ;;  %v1928_v44 = vld [vmem:[#allocation3 + $0x2e8] sm:$0xff] }
  0x5c   :  { %3031 = vst [vmem:[#allocation59_spill] sm:$0xff] %v1920_v41  ;;  %3032 = vst [vmem:[#allocation60_spill] sm:$0xff] %v1922_v37  ;;  %v1930_v23 = vld [vmem:[#allocation3 + $0x2f0] sm:$0xff]  ;;  %v1936_v62 = vld [vmem:[#allocation3 + $0x2f8] sm:$0xff] }
  0x5d   :  { %3033 = vst [vmem:[#allocation61_spill] sm:$0xff] %v1928_v44  ;;  %3034 = vst [vmem:[#allocation62_spill] sm:$0xff] %v1930_v23  ;;  %v1938_v13 = vld [vmem:[#allocation3 + $0x300] sm:$0xff]  ;;  %v1944_v50 = vld [vmem:[#allocation3 + $0x308] sm:$0xff] }
  0x5e   :  { %3035 = vst [vmem:[#allocation63_spill] sm:$0xff] %v1936_v62  ;;  %3036 = vst [vmem:[#allocation64_spill] sm:$0xff] %v1938_v13  ;;  %v1946_v32 = vld [vmem:[#allocation3 + $0x310] sm:$0xff]  ;;  %v1952_v35 = vld [vmem:[#allocation3 + $0x318] sm:$0xff] }
  0x5f   :  { %3037 = vst [vmem:[#allocation65_spill] sm:$0xff] %v1944_v50  ;;  %3038 = vst [vmem:[#allocation66_spill] sm:$0xff] %v1946_v32  ;;  %v1954_v31 = vld [vmem:[#allocation3 + $0x320] sm:$0xff]  ;;  %v1960_v7 = vld [vmem:[#allocation3 + $0x328] sm:$0xff] }
  0x60   :  { %3039 = vst [vmem:[#allocation67_spill] sm:$0xff] %v1952_v35  ;;  %3040 = vst [vmem:[#allocation68_spill] sm:$0xff] %v1954_v31  ;;  %v1962_v24 = vld [vmem:[#allocation3 + $0x330] sm:$0xff]  ;;  %v1968_v41 = vld [vmem:[#allocation3 + $0x338] sm:$0xff] }
  0x61   :  { %3041 = vst [vmem:[#allocation69_spill] sm:$0xff] %v1960_v7  ;;  %3042 = vst [vmem:[#allocation70_spill] sm:$0xff] %v1962_v24  ;;  %v1970_v60 = vld [vmem:[#allocation3 + $0x340] sm:$0xff]  ;;  %v1976_v44 = vld [vmem:[#allocation3 + $0x348] sm:$0xff]  ;;  %v3070_v24 = vunpack.c.h.bf16 %v1592_v15 }
  0x62   :  { %3043 = vst [vmem:[#allocation71_spill] sm:$0xff] %v1968_v41  ;;  %3044 = vst [vmem:[#allocation72_spill] sm:$0xff] %v1970_v60  ;;  %v1978_v55 = vld [vmem:[#allocation3 + $0x350] sm:$0xff]  ;;  %v1984_v13 = vld [vmem:[#allocation3 + $0x358] sm:$0xff] }
  0x63   :  { %3045 = vst [vmem:[#allocation73_spill] sm:$0xff] %v1976_v44  ;;  %3046 = vst [vmem:[#allocation74_spill] sm:$0xff] %v1978_v55  ;;  %v1986_v6 = vld [vmem:[#allocation3 + $0x360] sm:$0xff]  ;;  %v1992_v50 = vld [vmem:[#allocation3 + $0x368] sm:$0xff]  ;;  %v3063_v55 = vunpack.c.l.bf16 %v1568_v0 }
  0x64   :  { %3047 = vst [vmem:[#allocation75_spill] sm:$0xff] %v1984_v13  ;;  %3048 = vst [vmem:[#allocation76_spill] sm:$0xff] %v1986_v6  ;;  %v1994_v59 = vld [vmem:[#allocation3 + $0x370] sm:$0xff]  ;;  %v2000_v35 = vld [vmem:[#allocation3 + $0x378] sm:$0xff]  ;;  %v3068_v6 = vunpack.c.l.bf16 %v1592_v15  ;;  %v3078_v15 = vunpack.c.h.bf16 %v1600_v21 }
  0x65   :  { %3049 = vst [vmem:[#allocation77_spill] sm:$0xff] %v1992_v50  ;;  %3050 = vst [vmem:[#allocation78_spill] sm:$0xff] %v1994_v59  ;;  %v2002_v36 = vld [vmem:[#allocation3 + $0x380] sm:$0xff]  ;;  %v2008_v7 = vld [vmem:[#allocation3 + $0x388] sm:$0xff] }
  0x66   :  { %3051 = vst [vmem:[#allocation79_spill] sm:$0xff] %v2000_v35  ;;  %3052 = vst [vmem:[#allocation80_spill] sm:$0xff] %v2002_v36  ;;  %v2010_v19 = vld [vmem:[#allocation3 + $0x390] sm:$0xff]  ;;  %v2016_v60 = vld [vmem:[#allocation3 + $0x398] sm:$0xff]  ;;  %v3067_v35 = vunpack.c.l.bf16 %v1570_v1 }
  0x67   :  { %3053 = vst [vmem:[#allocation81_spill] sm:$0xff] %v2008_v7  ;;  %3054 = vst [vmem:[#allocation82_spill] sm:$0xff] %v2010_v19  ;;  %v2018_v38 = vld [vmem:[#allocation3 + $0x3a0] sm:$0xff]  ;;  %v2024_v44 = vld [vmem:[#allocation3 + $0x3a8] sm:$0xff]  ;;  %v3064_v19 = vunpack.c.l.bf16 %v1586_v10 }
  0x68   :  { %3055 = vst [vmem:[#allocation83_spill] sm:$0xff] %v2018_v38  ;;  %3056 = vst [vmem:[#allocation84_spill] sm:$0xff] %v2024_v44  ;;  %v2026_v62 = vld [vmem:[#allocation3 + $0x3b0] sm:$0xff]  ;;  %v2032_v13 = vld [vmem:[#allocation3 + $0x3b8] sm:$0xff]  ;;  %v3066_v44 = vunpack.c.h.bf16 %v1586_v10  ;;  %v3069_v38 = vunpack.c.h.bf16 %v1570_v1  ;;  %v3074_v10 = vunpack.c.h.bf16 %v1594_v16  ;;  %v3077_v1 = vunpack.c.h.bf16 %v1574_v3 }
  0x69   :  { %3057 = vst [vmem:[#allocation85_spill] sm:$0xff] %v2026_v62  ;;  %3058 = vst [vmem:[#allocation86_spill] sm:$0xff] %v2032_v13  ;;  %v2034_v23 = vld [vmem:[#allocation3 + $0x3c0] sm:$0xff]  ;;  %v2040_v50 = vld [vmem:[#allocation3 + $0x3c8] sm:$0xff]  ;;  %v448_v13 = vadd.f32 %v3064_v19, %v3063_v55  ;;  %v3065_v62 = vunpack.c.h.bf16 %v1568_v0  ;;  %v3073_v0 = vunpack.c.h.bf16 %v1572_v2  ;;  %v3075_v55 = vunpack.c.l.bf16 %v1574_v3 }
  0x6a   :  { %v2042_v37 = vld [vmem:[#allocation3 + $0x3d0] sm:$0xff]  ;;  %v2048_v36 = vld [vmem:[#allocation3 + $0x3d8] sm:$0xff]  ;;  %v2050_v32 = vld [vmem:[#allocation3 + $0x3e0] sm:$0xff]  ;;  %v487_v59 = vadd.f32 %v3070_v24, %v3069_v38  ;;  %v539_v24 = vadd.f32 %v3078_v15, %v3077_v1  ;;  %v3084_v3 = vunpack.c.h.bf16 %v1626_v40 }
  0x6b   :  { %3059 = vst [vmem:[#allocation87_spill] sm:$0xff] %v2048_v36  ;;  %3060 = vst [vmem:[#allocation88_spill] sm:$0xff] %v2050_v32  ;;  %v2056_v7 = vld [vmem:[#allocation3 + $0x3e8] sm:$0xff]  ;;  %v2058_v41 = vld [vmem:[#allocation3 + $0x3f0] sm:$0xff]  ;;  %v461_v31 = vadd.f32 %v3066_v44, %v3065_v62  ;;  %v474_v32 = vadd.f32 %v3068_v6, %v3067_v35  ;;  %v513_v44 = vadd.f32 %v3074_v10, %v3073_v0  ;;  %v3076_v62 = vunpack.c.l.bf16 %v1600_v21 }
  0x6c   :  { %3061 = vst [vmem:[#allocation89_spill] sm:$0xff] %v2056_v7  ;;  %3062 = vst [vmem:[#allocation90_spill] sm:$0xff] %v2058_v41  ;;  %v3071_v41 = vunpack.c.l.bf16 %v1572_v2  ;;  %v3072_v7 = vunpack.c.l.bf16 %v1594_v16  ;;  %v3079_v35 = vunpack.c.l.bf16 %v1618_v34  ;;  %v3081_v2 = vunpack.c.l.bf16 %v1624_v39 }
  0x6d   :  { %v526_v6 = vadd.f32 %v3076_v62, %v3075_v55  ;;  %v3082_v0 = vunpack.c.h.bf16 %v1624_v39  ;;  %v3083_v36 = vunpack.c.l.bf16 %v1626_v40  ;;  %v514_v62 = vadd.f32 %v513_v44, %v3084_v3 }
  0x6e   :  { %v500_v19 = vadd.f32 %v3072_v7, %v3071_v41  ;;  %v449_v38 = vadd.f32 %v448_v13, %v3079_v35  ;;  %v3080_v7 = vunpack.c.h.bf16 %v1618_v34  ;;  %v475_v16 = vadd.f32 %v474_v32, %v3081_v2 }
  0x6f   :  { %v488_v10 = vadd.f32 %v487_v59, %v3082_v0  ;;  %v3085_v21 = vunpack.c.l.bf16 %v1632_v45  ;;  %v3086_v13 = vunpack.c.h.bf16 %v1632_v45  ;;  %v3088_v32 = vunpack.c.h.bf16 %v1650_v58 }
  0x70   :  { %v462_v41 = vadd.f32 %v461_v31, %v3080_v7  ;;  %v501_v55 = vadd.f32 %v500_v19, %v3083_v36  ;;  %v3087_v31 = vunpack.c.l.bf16 %v1650_v58  ;;  %v3089_v39 = vunpack.c.l.bf16 %v1656_v63 }
  0x71   :  { %v527_v1 = vadd.f32 %v526_v6, %v3085_v21  ;;  %v540_v15 = vadd.f32 %v539_v24, %v3086_v13  ;;  %v3090_v36 = vunpack.c.h.bf16 %v1656_v63  ;;  %v3091_v40 = vunpack.c.l.bf16 %v1658_v30 }
  0x72   :  { %v450_v34 = vadd.f32 %v449_v38, %v3087_v31  ;;  %v463_v35 = vadd.f32 %v462_v41, %v3088_v32  ;;  %v476_v59 = vadd.f32 %v475_v16, %v3089_v39  ;;  %v3092_v6 = vunpack.c.h.bf16 %v1658_v30 }
  0x73   :  { %v489_v19 = vadd.f32 %v488_v10, %v3090_v36  ;;  %v502_v44 = vadd.f32 %v501_v55, %v3091_v40  ;;  %v3093_v45 = vunpack.c.l.bf16 %v1664_v26  ;;  %v3094_v38 = vunpack.c.h.bf16 %v1664_v26 }
  0x74   :  { %v515_v7 = vadd.f32 %v514_v62, %v3092_v6  ;;  %v3095_v58 = vunpack.c.l.bf16 %v1682_v25  ;;  %v3096_v16 = vunpack.c.h.bf16 %v1682_v25  ;;  %v3097_v63 = vunpack.c.l.bf16 %v1688_v54 }
  0x75   :  { %v528_v24 = vadd.f32 %v527_v1, %v3093_v45  ;;  %v541_v2 = vadd.f32 %v540_v15, %v3094_v38  ;;  %v3098_v55 = vunpack.c.h.bf16 %v1688_v54  ;;  %v3099_v30 = vunpack.c.l.bf16 %v1690_v29 }
  0x76   :  { %v451_v41 = vadd.f32 %v450_v34, %v3095_v58  ;;  %v464_v0 = vadd.f32 %v463_v35, %v3096_v16  ;;  %v477_v10 = vadd.f32 %v476_v59, %v3097_v63  ;;  %v3100_v21 = vunpack.c.h.bf16 %v1690_v29 }
  0x77   :  { %v490_v3 = vadd.f32 %v489_v19, %v3098_v55  ;;  %v503_v62 = vadd.f32 %v502_v44, %v3099_v30  ;;  %v3101_v26 = vunpack.c.l.bf16 %v1696_v61  ;;  %v3102_v15 = vunpack.c.h.bf16 %v1696_v61 }
  0x78   :  { %v516_v1 = vadd.f32 %v515_v7, %v3100_v21  ;;  %v3103_v25 = vunpack.c.l.bf16 %v1714_v48  ;;  %v3104_v32 = vunpack.c.h.bf16 %v1714_v48  ;;  %v3105_v54 = vunpack.c.l.bf16 %v1720_v18 }
  0x79   :  { %v529_v13 = vadd.f32 %v528_v24, %v3101_v26  ;;  %v542_v31 = vadd.f32 %v541_v2, %v3102_v15  ;;  %v3106_v59 = vunpack.c.h.bf16 %v1720_v18  ;;  %v3107_v29 = vunpack.c.l.bf16 %v1722_v20 }
  0x7a   :  { %v452_v34 = vadd.f32 %v451_v41, %v3103_v25  ;;  %v465_v35 = vadd.f32 %v464_v0, %v3104_v32  ;;  %v478_v39 = vadd.f32 %v477_v10, %v3105_v54  ;;  %v3108_v40 = vunpack.c.h.bf16 %v1722_v20 }
  0x7b   :  { %v491_v36 = vadd.f32 %v490_v3, %v3106_v59  ;;  %v504_v19 = vadd.f32 %v503_v62, %v3107_v29  ;;  %v3109_v61 = vunpack.c.l.bf16 %v1728_v17  ;;  %v3110_v7 = vunpack.c.h.bf16 %v1728_v17 }
  0x7c   :  { %v517_v44 = vadd.f32 %v516_v1, %v3108_v40  ;;  %v3111_v48 = vunpack.c.l.bf16 %v1746_v53  ;;  %v3112_v38 = vunpack.c.h.bf16 %v1746_v53  ;;  %v3113_v18 = vunpack.c.l.bf16 %v1752_v12 }
  0x7d   :  { %v530_v6 = vadd.f32 %v529_v13, %v3109_v61  ;;  %v543_v45 = vadd.f32 %v542_v31, %v3110_v7  ;;  %v3114_v41 = vunpack.c.h.bf16 %v1752_v12  ;;  %v3115_v20 = vunpack.c.l.bf16 %v1754_v43 }
  0x7e   :  { %v453_v24 = vadd.f32 %v452_v34, %v3111_v48  ;;  %v466_v2 = vadd.f32 %v465_v35, %v3112_v38  ;;  %v479_v58 = vadd.f32 %v478_v39, %v3113_v18  ;;  %v3116_v63 = vunpack.c.h.bf16 %v1754_v43 }
  0x7f   :  { %v492_v16 = vadd.f32 %v491_v36, %v3114_v41  ;;  %v505_v0 = vadd.f32 %v504_v19, %v3115_v20  ;;  %v3117_v17 = vunpack.c.l.bf16 %v1760_v11  ;;  %v3118_v3 = vunpack.c.h.bf16 %v1760_v11 }
  0x80   :  { %v518_v10 = vadd.f32 %v517_v44, %v3116_v63  ;;  %v3119_v53 = vunpack.c.l.bf16 %v1778_v42  ;;  %v3120_v21 = vunpack.c.h.bf16 %v1778_v42  ;;  %v3121_v12 = vunpack.c.l.bf16 %v1784_v14 }
  0x81   :  { %v531_v55 = vadd.f32 %v530_v6, %v3117_v17  ;;  %v544_v30 = vadd.f32 %v543_v45, %v3118_v3  ;;  %v3122_v13 = vunpack.c.h.bf16 %v1784_v14  ;;  %v3123_v43 = vunpack.c.l.bf16 %v1786_v56 }
  0x82   :  { %v454_v62 = vadd.f32 %v453_v24, %v3119_v53  ;;  %v467_v1 = vadd.f32 %v466_v2, %v3120_v21  ;;  %v480_v26 = vadd.f32 %v479_v58, %v3121_v12  ;;  %v3124_v25 = vunpack.c.h.bf16 %v1786_v56 }
  0x83   :  { %v493_v15 = vadd.f32 %v492_v16, %v3122_v13  ;;  %v506_v31 = vadd.f32 %v505_v0, %v3123_v43  ;;  %v3125_v11 = vunpack.c.l.bf16 %v1792_v47  ;;  %v3126_v35 = vunpack.c.h.bf16 %v1792_v47  ;;  %v2204_v0 = vld [vmem:[#allocation3 + $0x3f8] sm:$0xff] }
  0x84   :  { %v519_v34 = vadd.f32 %v518_v10, %v3124_v25  ;;  %v455_v42 = vrot.slane %v454_v62, 4  ;;  %v468_v39 = vrot.slane %v467_v1, 4  ;;  %v481_v59 = vrot.slane %v480_v26, 4 }
  0x85   :  { %v532_v32 = vadd.f32 %v531_v55, %v3125_v11  ;;  %v545_v54 = vadd.f32 %v544_v30, %v3126_v35  ;;  %v494_v36 = vrot.slane %v493_v15, 4  ;;  %v507_v29 = vrot.slane %v506_v31, 4 }
  0x86   :  { %v520_v19 = vrot.slane %v519_v34, 4  ;;  %v456_v44 = vadd.f32 %v455_v42, %v454_v62  ;;  %v469_v61 = vadd.f32 %v468_v39, %v467_v1  ;;  %v482_v6 = vadd.f32 %v481_v59, %v480_v26 }
  0x87   :  { %v533_v14 = vrot.slane %v532_v32, 4  ;;  %v546_v40 = vrot.slane %v545_v54, 4  ;;  %v495_v7 = vadd.f32 %v494_v36, %v493_v15  ;;  %v508_v56 = vadd.f32 %v507_v29, %v506_v31 }
  0x88   :  { %v521_v45 = vadd.f32 %v520_v19, %v519_v34  ;;  %v457_v38 = vrot.slane %v456_v44, 2  ;;  %v470_v2 = vrot.slane %v469_v61, 2  ;;  %v483_v47 = vrot.slane %v482_v6, 2 }
  0x89   :  { %v534_v48 = vadd.f32 %v533_v14, %v532_v32  ;;  %v547_v24 = vadd.f32 %v546_v40, %v545_v54  ;;  %v496_v18 = vrot.slane %v495_v7, 2  ;;  %v509_v58 = vrot.slane %v508_v56, 2 }
  0x8a   :  { %v522_v41 = vrot.slane %v521_v45, 2  ;;  %v458_v63 = vadd.f32 %v457_v38, %v456_v44  ;;  %v471_v10 = vadd.f32 %v470_v2, %v469_v61  ;;  %v484_v17 = vadd.f32 %v483_v47, %v482_v6 }
  0x8b   :  { %v535_v16 = vrot.slane %v534_v48, 2  ;;  %v548_v20 = vrot.slane %v547_v24, 2  ;;  %v497_v55 = vadd.f32 %v496_v18, %v495_v7  ;;  %v510_v3 = vadd.f32 %v509_v58, %v508_v56 }
  0x8c   :  { %v523_v30 = vadd.f32 %v522_v41, %v521_v45  ;;  %v459_v21 = vrot.slane %v458_v63, 1  ;;  %v472_v1 = vrot.slane %v471_v10, 1  ;;  %v485_v12 = vrot.slane %v484_v17, 1 }
  0x8d   :  { %v2206_v53 = vadd.f32 %v535_v16, %v534_v48  ;;  %v2208_v62 = vadd.f32 %v548_v20, %v547_v24  ;;  %v498_v26 = vrot.slane %v497_v55, 1  ;;  %v446_v13 = vunpack.c.l.bf16 %v2204_v0 }
  0x8e   :  { %v447_v15 = vunpack.c.h.bf16 %v2204_v0  ;;  %v511_v43 = vrot.slane %v510_v3, 1  ;;  %v524_v31 = vrot.slane %v523_v30, 1  ;;  %v2212_v25 = vadd.f32 %v459_v21, %v458_v63 }
  0x8f   :  { %v2214_v34 = vadd.f32 %v472_v1, %v471_v10  ;;  %v537_v11 = vrot.slane %v2206_v53, 1  ;;  %v550_v32 = vrot.slane %v2208_v62, 1  ;;  %v2218_v35 = vadd.f32 %v485_v12, %v484_v17 }
  0x90   :  { %v2220_v54 = vadd.f32 %v498_v26, %v497_v55  ;;  %v2222_v42 = vadd.f32 %v511_v43, %v510_v3  ;;  %v2224_v39 = vadd.f32 %v524_v31, %v523_v30  ;;  %v3127_v59 = vunpack.c.l.bf16 %v1576_v4 }
  0x91   :  { %v3128_v36 = vunpack.c.l.bf16 %v1602_v22  ;;  %v3129_v19 = vunpack.c.h.bf16 %v1576_v4  ;;  %v3130_v14 = vunpack.c.h.bf16 %v1602_v22  ;;  %v3131_v44 = vunpack.c.l.bf16 %v1578_v5 }
  0x92   :  { %v3132_v61 = vunpack.c.l.bf16 %v1608_v27  ;;  %v3133_v7 = vunpack.c.h.bf16 %v1578_v5  ;;  %v3134_v56 = vunpack.c.h.bf16 %v1608_v27  ;;  %v3135_v48 = vunpack.c.l.bf16 %v1582_v8 }
  0x93   :  { %v552_v29 = vadd.f32 %v3128_v36, %v3127_v59  ;;  %v565_v40 = vadd.f32 %v3130_v14, %v3129_v19  ;;  %v3136_v24 = vunpack.c.l.bf16 %v1610_v28  ;;  %v3137_v4 = vunpack.c.h.bf16 %v1582_v8 }
  0x94   :  { %v578_v6 = vadd.f32 %v3132_v61, %v3131_v44  ;;  %v591_v45 = vadd.f32 %v3134_v56, %v3133_v7  ;;  %v3138_v22 = vunpack.c.h.bf16 %v1610_v28  ;;  %v3139_v47 = vunpack.c.l.bf16 %v1584_v9 }
  0x95   :  { %v604_v38 = vadd.f32 %v3136_v24, %v3135_v48  ;;  %v3140_v18 = vunpack.c.l.bf16 %v1616_v33  ;;  %v3141_v5 = vunpack.c.h.bf16 %v1584_v9  ;;  %v3142_v27 = vunpack.c.h.bf16 %v1616_v33 }
  0x96   :  { %v617_v2 = vadd.f32 %v3138_v22, %v3137_v4  ;;  %v3143_v16 = vunpack.c.l.bf16 %v1634_v46  ;;  %v3144_v63 = vunpack.c.h.bf16 %v1634_v46  ;;  %v3145_v8 = vunpack.c.l.bf16 %v1640_v51 }
  0x97   :  { %v630_v58 = vadd.f32 %v3140_v18, %v3139_v47  ;;  %v643_v41 = vadd.f32 %v3142_v27, %v3141_v5  ;;  %v3146_v17 = vunpack.c.h.bf16 %v1640_v51  ;;  %v3147_v3 = vunpack.c.l.bf16 %v1642_v52  ;;  %v3153_v51 = vld [vmem:[#allocation13_spill] sm:$0xff]  ;;  %v3168_v27 = vld [vmem:[#allocation18_spill] sm:$0xff] }
  0x98   :  { %v553_v20 = vadd.f32 %v552_v29, %v3143_v16  ;;  %v566_v10 = vadd.f32 %v565_v40, %v3144_v63  ;;  %v579_v28 = vadd.f32 %v578_v6, %v3145_v8  ;;  %v3148_v9 = vunpack.c.h.bf16 %v1642_v52  ;;  %v3156_v52 = vld [vmem:[#allocation14_spill] sm:$0xff] }
  0x99   :  { %v592_v55 = vadd.f32 %v591_v45, %v3146_v17  ;;  %v605_v30 = vadd.f32 %v604_v38, %v3147_v3  ;;  %v3149_v33 = vunpack.c.l.bf16 %v1648_v57  ;;  %v3150_v12 = vunpack.c.h.bf16 %v1648_v57  ;;  %v3159_v57 = vld [vmem:[#allocation15_spill] sm:$0xff]  ;;  %v3174_v3 = vld [vmem:[#allocation20_spill] sm:$0xff] }
  0x9a   :  { %v618_v21 = vadd.f32 %v617_v2, %v3148_v9  ;;  %v3151_v46 = vunpack.c.l.bf16 %v1666_v49  ;;  %v3152_v31 = vunpack.c.h.bf16 %v1666_v49  ;;  %v3154_v36 = vunpack.c.l.bf16 %v3153_v51  ;;  %v3162_v49 = vld [vmem:[#allocation16_spill] sm:$0xff]  ;;  %v3165_v2 = vld [vmem:[#allocation17_spill] sm:$0xff] }
  0x9b   :  { %v631_v1 = vadd.f32 %v630_v58, %v3149_v33  ;;  %v644_v26 = vadd.f32 %v643_v41, %v3150_v12  ;;  %v3155_v19 = vunpack.c.h.bf16 %v3153_v51  ;;  %v3157_v40 = vunpack.c.l.bf16 %v3156_v52 }
  0x9c   :  { %v554_v43 = vadd.f32 %v553_v20, %v3151_v46  ;;  %v567_v59 = vadd.f32 %v566_v10, %v3152_v31  ;;  %v580_v29 = vadd.f32 %v579_v28, %v3154_v36  ;;  %v3158_v61 = vunpack.c.h.bf16 %v3156_v52  ;;  %v3171_v10 = vld [vmem:[#allocation19_spill] sm:$0xff]  ;;  %v3180_v31 = vld [vmem:[#allocation22_spill] sm:$0xff] }
  0x9d   :  { %v593_v14 = vadd.f32 %v592_v55, %v3155_v19  ;;  %v606_v44 = vadd.f32 %v605_v30, %v3157_v40  ;;  %v3160_v7 = vunpack.c.l.bf16 %v3159_v57  ;;  %v3161_v45 = vunpack.c.h.bf16 %v3159_v57  ;;  %v3183_v19 = vld [vmem:[#allocation23_spill] sm:$0xff] }
  0x9e   :  { %v619_v6 = vadd.f32 %v618_v21, %v3158_v61  ;;  %v3163_v24 = vunpack.c.l.bf16 %v3162_v49  ;;  %v3164_v4 = vunpack.c.h.bf16 %v3162_v49  ;;  %v3166_v47 = vunpack.c.l.bf16 %v3165_v2  ;;  %v3186_v61 = vld [vmem:[#allocation24_spill] sm:$0xff] }
  0x9f   :  { %v632_v56 = vadd.f32 %v631_v1, %v3160_v7  ;;  %v645_v48 = vadd.f32 %v644_v26, %v3161_v45  ;;  %v3167_v58 = vunpack.c.h.bf16 %v3165_v2  ;;  %v3169_v41 = vunpack.c.l.bf16 %v3168_v27  ;;  %v3177_v1 = vld [vmem:[#allocation21_spill] sm:$0xff] }
  0xa0   :  { %v555_v38 = vadd.f32 %v554_v43, %v3163_v24  ;;  %v568_v22 = vadd.f32 %v567_v59, %v3164_v4  ;;  %v581_v18 = vadd.f32 %v580_v29, %v3166_v47  ;;  %v3170_v20 = vunpack.c.h.bf16 %v3168_v27  ;;  %v3189_v45 = vld [vmem:[#allocation25_spill] sm:$0xff]  ;;  %v3192_v4 = vld [vmem:[#allocation26_spill] sm:$0xff] }
  0xa1   :  { %v594_v5 = vadd.f32 %v593_v14, %v3167_v58  ;;  %v607_v16 = vadd.f32 %v606_v44, %v3169_v41  ;;  %v3172_v8 = vunpack.c.l.bf16 %v3171_v10  ;;  %v3173_v17 = vunpack.c.h.bf16 %v3171_v10  ;;  %v3195_v58 = vld [vmem:[#allocation27_spill] sm:$0xff] }
  0xa2   :  { %v620_v63 = vadd.f32 %v619_v6, %v3170_v20  ;;  %v3175_v30 = vunpack.c.l.bf16 %v3174_v3  ;;  %v3176_v21 = vunpack.c.h.bf16 %v3174_v3  ;;  %v3178_v12 = vunpack.c.l.bf16 %v3177_v1  ;;  %v3198_v20 = vld [vmem:[#allocation28_spill] sm:$0xff] }
  0xa3   :  { %v633_v28 = vadd.f32 %v632_v56, %v3172_v8  ;;  %v646_v55 = vadd.f32 %v645_v48, %v3173_v17  ;;  %v3179_v46 = vunpack.c.h.bf16 %v3177_v1  ;;  %v3181_v59 = vunpack.c.l.bf16 %v3180_v31  ;;  %v3201_v17 = vld [vmem:[#allocation29_spill] sm:$0xff] }
  0xa4   :  { %v556_v9 = vadd.f32 %v555_v38, %v3175_v30  ;;  %v569_v33 = vadd.f32 %v568_v22, %v3176_v21  ;;  %v582_v26 = vadd.f32 %v581_v18, %v3178_v12  ;;  %v3182_v36 = vunpack.c.h.bf16 %v3180_v31  ;;  %v3204_v21 = vld [vmem:[#allocation30_spill] sm:$0xff] }
  0xa5   :  { %v595_v43 = vadd.f32 %v594_v5, %v3179_v46  ;;  %v608_v51 = vadd.f32 %v607_v16, %v3181_v59  ;;  %v3184_v14 = vunpack.c.l.bf16 %v3183_v19  ;;  %v3185_v40 = vunpack.c.h.bf16 %v3183_v19  ;;  %v3207_v46 = vld [vmem:[#allocation31_spill] sm:$0xff] }
  0xa6   :  { %v621_v29 = vadd.f32 %v620_v63, %v3182_v36  ;;  %v3187_v6 = vunpack.c.l.bf16 %v3186_v61  ;;  %v3188_v7 = vunpack.c.h.bf16 %v3186_v61  ;;  %v3190_v48 = vunpack.c.l.bf16 %v3189_v45 }
  0xa7   :  { %v634_v52 = vadd.f32 %v633_v28, %v3184_v14  ;;  %v647_v44 = vadd.f32 %v646_v55, %v3185_v40  ;;  %v3191_v24 = vunpack.c.h.bf16 %v3189_v45  ;;  %v3193_v22 = vunpack.c.l.bf16 %v3192_v4 }
  0xa8   :  { %v557_v57 = vadd.f32 %v556_v9, %v3187_v6  ;;  %v570_v56 = vadd.f32 %v569_v33, %v3188_v7  ;;  %v583_v49 = vadd.f32 %v582_v26, %v3190_v48  ;;  %v3194_v47 = vunpack.c.h.bf16 %v3192_v4 }
  0xa9   :  { %v596_v38 = vadd.f32 %v595_v43, %v3191_v24  ;;  %v609_v2 = vadd.f32 %v608_v51, %v3193_v22  ;;  %v3196_v5 = vunpack.c.l.bf16 %v3195_v58  ;;  %v3197_v41 = vunpack.c.h.bf16 %v3195_v58 }
  0xaa   :  { %v622_v18 = vadd.f32 %v621_v29, %v3194_v47  ;;  %v3199_v63 = vunpack.c.l.bf16 %v3198_v20  ;;  %v3200_v8 = vunpack.c.h.bf16 %v3198_v20  ;;  %v3202_v55 = vunpack.c.l.bf16 %v3201_v17 }
  0xab   :  { %v635_v27 = vadd.f32 %v634_v52, %v3196_v5  ;;  %v648_v16 = vadd.f32 %v647_v44, %v3197_v41  ;;  %v3203_v30 = vunpack.c.h.bf16 %v3201_v17  ;;  %v3205_v33 = vunpack.c.l.bf16 %v3204_v21 }
  0xac   :  { %v558_v10 = vadd.f32 %v557_v57, %v3199_v63  ;;  %v571_v28 = vadd.f32 %v570_v56, %v3200_v8  ;;  %v584_v3 = vadd.f32 %v583_v49, %v3202_v55  ;;  %v3206_v12 = vunpack.c.h.bf16 %v3204_v21 }
  0xad   :  { %v597_v9 = vadd.f32 %v596_v38, %v3203_v30  ;;  %v610_v1 = vadd.f32 %v609_v2, %v3205_v33  ;;  %v3208_v43 = vunpack.c.l.bf16 %v3207_v46  ;;  %v3209_v59 = vunpack.c.h.bf16 %v3207_v46 }
  0xae   :  { %v623_v26 = vadd.f32 %v622_v18, %v3206_v12  ;;  %v559_v36 = vrot.slane %v558_v10, 4  ;;  %v572_v29 = vrot.slane %v571_v28, 4  ;;  %v585_v19 = vrot.slane %v584_v3, 4 }
  0xaf   :  { %v636_v31 = vadd.f32 %v635_v27, %v3208_v43  ;;  %v649_v51 = vadd.f32 %v648_v16, %v3209_v59  ;;  %v598_v14 = vrot.slane %v597_v9, 4  ;;  %v611_v52 = vrot.slane %v610_v1, 4 }
  0xb0   :  { %v624_v40 = vrot.slane %v623_v26, 4  ;;  %v560_v6 = vadd.f32 %v559_v36, %v558_v10  ;;  %v573_v57 = vadd.f32 %v572_v29, %v571_v28  ;;  %v586_v7 = vadd.f32 %v585_v19, %v584_v3 }
  0xb1   :  { %v637_v44 = vrot.slane %v636_v31, 4  ;;  %v650_v61 = vrot.slane %v649_v51, 4  ;;  %v599_v56 = vadd.f32 %v598_v14, %v597_v9  ;;  %v612_v45 = vadd.f32 %v611_v52, %v610_v1 }
  0xb2   :  { %v625_v48 = vadd.f32 %v624_v40, %v623_v26  ;;  %v561_v38 = vrot.slane %v560_v6, 2  ;;  %v574_v4 = vrot.slane %v573_v57, 2  ;;  %v587_v22 = vrot.slane %v586_v7, 2  ;;  %v3216_v40 = vld [vmem:[#allocation33_spill] sm:$0xff] }
  0xb3   :  { %v638_v49 = vadd.f32 %v637_v44, %v636_v31  ;;  %v651_v24 = vadd.f32 %v650_v61, %v649_v51  ;;  %v600_v2 = vrot.slane %v599_v56, 2  ;;  %v613_v47 = vrot.slane %v612_v45, 2  ;;  %v3212_v51 = vld [vmem:[#allocation40_spill] sm:$0xff]  ;;  %v3218_v61 = vld [vmem:[#allocation41_spill] sm:$0xff] }
  0xb4   :  { %v626_v18 = vrot.slane %v625_v48, 2  ;;  %v562_v27 = vadd.f32 %v561_v38, %v560_v6  ;;  %v575_v41 = vadd.f32 %v574_v4, %v573_v57  ;;  %v588_v16 = vadd.f32 %v587_v22, %v586_v7 }
  0xb5   :  { %v639_v58 = vrot.slane %v638_v49, 2  ;;  %v652_v5 = vrot.slane %v651_v24, 2  ;;  %v601_v20 = vadd.f32 %v600_v2, %v599_v56  ;;  %v614_v63 = vadd.f32 %v613_v47, %v612_v45 }
  0xb6   :  { %v627_v10 = vadd.f32 %v626_v18, %v625_v48  ;;  %v563_v17 = vrot.slane %v562_v27, 1  ;;  %v576_v55 = vrot.slane %v575_v41, 1  ;;  %v589_v3 = vrot.slane %v588_v16, 1  ;;  %v3222_v48 = vld [vmem:[#allocation34_spill] sm:$0xff]  ;;  %v3228_v18 = vld [vmem:[#allocation35_spill] sm:$0xff] }
  0xb7   :  { %v2354_v8 = vadd.f32 %v639_v58, %v638_v49  ;;  %v2356_v28 = vadd.f32 %v652_v5, %v651_v24  ;;  %v602_v30 = vrot.slane %v601_v20, 1  ;;  %v2361_v9 = vadd.f32 %v537_v11, %v2206_v53  ;;  %v3224_v24 = vld [vmem:[#allocation42_spill] sm:$0xff]  ;;  %v3230_v5 = vld [vmem:[#allocation43_spill] sm:$0xff] }
  0xb8   :  { %v2366_v21 = vadd.f32 %v550_v32, %v2208_v62  ;;  %v615_v33 = vrot.slane %v614_v63, 1  ;;  %v628_v1 = vrot.slane %v627_v10, 1  ;;  %v2368_v12 = vadd.f32 %v563_v17, %v562_v27  ;;  %v3210_v62 = vld [vmem:[#allocation32_spill] sm:$0xff] }
  0xb9   :  { %v2370_v26 = vadd.f32 %v576_v55, %v575_v41  ;;  %v641_v46 = vrot.slane %v2354_v8, 1  ;;  %v654_v43 = vrot.slane %v2356_v28, 1  ;;  %v2374_v31 = vadd.f32 %v589_v3, %v588_v16 }
  0xba   :  { %v2376_v59 = vadd.f32 %v602_v30, %v601_v20  ;;  %v2378_v53 = vadd.f32 %v615_v33, %v614_v63  ;;  %v2380_v11 = vadd.f32 %v628_v1, %v627_v10  ;;  %v3211_v32 = vunpack.c.l.bf16 %v3210_v62  ;;  %v3234_v10 = vld [vmem:[#allocation48_spill] sm:$0xff]  ;;  %v3237_v33 = vld [vmem:[#allocation49_spill] sm:$0xff] }
  0xbb   :  { %v3213_v36 = vunpack.c.l.bf16 %v3212_v51  ;;  %v3214_v19 = vunpack.c.h.bf16 %v3210_v62  ;;  %v3215_v14 = vunpack.c.h.bf16 %v3212_v51  ;;  %v3217_v44 = vunpack.c.l.bf16 %v3216_v40 }
  0xbc   :  { %v3219_v6 = vunpack.c.l.bf16 %v3218_v61  ;;  %v3220_v7 = vunpack.c.h.bf16 %v3216_v40  ;;  %v3221_v56 = vunpack.c.h.bf16 %v3218_v61  ;;  %v3223_v49 = vunpack.c.l.bf16 %v3222_v48  ;;  %v3243_v61 = vld [vmem:[#allocation51_spill] sm:$0xff] }
  0xbd   :  { %v656_v29 = vadd.f32 %v3213_v36, %v3211_v32  ;;  %v669_v52 = vadd.f32 %v3215_v14, %v3214_v19  ;;  %v3225_v38 = vunpack.c.l.bf16 %v3224_v24  ;;  %v3226_v22 = vunpack.c.h.bf16 %v3222_v48  ;;  %v3240_v36 = vld [vmem:[#allocation50_spill] sm:$0xff]  ;;  %v3246_v48 = vld [vmem:[#allocation56_spill] sm:$0xff] }
  0xbe   :  { %v682_v57 = vadd.f32 %v3219_v6, %v3217_v44  ;;  %v695_v45 = vadd.f32 %v3221_v56, %v3220_v7  ;;  %v3227_v2 = vunpack.c.h.bf16 %v3224_v24  ;;  %v3229_v58 = vunpack.c.l.bf16 %v3228_v18 }
  0xbf   :  { %v708_v4 = vadd.f32 %v3225_v38, %v3223_v49  ;;  %v3231_v27 = vunpack.c.l.bf16 %v3230_v5  ;;  %v3232_v16 = vunpack.c.h.bf16 %v3228_v18  ;;  %v3233_v20 = vunpack.c.h.bf16 %v3230_v5  ;;  %v3249_v38 = vld [vmem:[#allocation57_spill] sm:$0xff]  ;;  %v3252_v18 = vld [vmem:[#allocation58_spill] sm:$0xff] }
  0xc0   :  { %v721_v47 = vadd.f32 %v3227_v2, %v3226_v22  ;;  %v3235_v17 = vunpack.c.l.bf16 %v3234_v10  ;;  %v3236_v3 = vunpack.c.h.bf16 %v3234_v10  ;;  %v3238_v1 = vunpack.c.l.bf16 %v3237_v33 }
  0xc1   :  { %v734_v41 = vadd.f32 %v3231_v27, %v3229_v58  ;;  %v747_v63 = vadd.f32 %v3233_v20, %v3232_v16  ;;  %v3239_v32 = vunpack.c.h.bf16 %v3237_v33  ;;  %v3241_v19 = vunpack.c.l.bf16 %v3240_v36 }
  0xc2   :  { %v657_v55 = vadd.f32 %v656_v29, %v3235_v17  ;;  %v670_v30 = vadd.f32 %v669_v52, %v3236_v3  ;;  %v683_v62 = vadd.f32 %v682_v57, %v3238_v1  ;;  %v3242_v40 = vunpack.c.h.bf16 %v3240_v36  ;;  %v3258_v17 = vld [vmem:[#allocation64_spill] sm:$0xff]  ;;  %v3261_v1 = vld [vmem:[#allocation65_spill] sm:$0xff] }
  0xc3   :  { %v696_v51 = vadd.f32 %v695_v45, %v3239_v32  ;;  %v709_v14 = vadd.f32 %v708_v4, %v3241_v19  ;;  %v3244_v6 = vunpack.c.l.bf16 %v3243_v61  ;;  %v3245_v29 = vunpack.c.h.bf16 %v3243_v61  ;;  %v3264_v19 = vld [vmem:[#allocation66_spill] sm:$0xff] }
  0xc4   :  { %v722_v44 = vadd.f32 %v721_v47, %v3242_v40  ;;  %v3247_v52 = vunpack.c.l.bf16 %v3246_v48  ;;  %v3248_v57 = vunpack.c.h.bf16 %v3246_v48  ;;  %v3250_v45 = vunpack.c.l.bf16 %v3249_v38 }
  0xc5   :  { %v735_v7 = vadd.f32 %v734_v41, %v3244_v6  ;;  %v748_v56 = vadd.f32 %v747_v63, %v3245_v29  ;;  %v3251_v4 = vunpack.c.h.bf16 %v3249_v38  ;;  %v3253_v47 = vunpack.c.l.bf16 %v3252_v18  ;;  %v3255_v41 = vld [vmem:[#allocation59_spill] sm:$0xff] }
  0xc6   :  { %v658_v49 = vadd.f32 %v657_v55, %v3247_v52  ;;  %v671_v24 = vadd.f32 %v670_v30, %v3248_v57  ;;  %v684_v22 = vadd.f32 %v683_v62, %v3250_v45  ;;  %v3254_v5 = vunpack.c.h.bf16 %v3252_v18  ;;  %v3267_v6 = vld [vmem:[#allocation67_spill] sm:$0xff]  ;;  %v3270_v52 = vld [vmem:[#allocation72_spill] sm:$0xff]  ;;  %v3273_v45 = vld [vmem:[#allocation73_spill] sm:$0xff] }
  0xc7   :  { %v697_v2 = vadd.f32 %v696_v51, %v3251_v4  ;;  %v710_v58 = vadd.f32 %v709_v14, %v3253_v47  ;;  %v3256_v16 = vunpack.c.l.bf16 %v3255_v41  ;;  %v3257_v63 = vunpack.c.h.bf16 %v3255_v41  ;;  %v3276_v47 = vld [vmem:[#allocation74_spill] sm:$0xff] }
  0xc8   :  { %v723_v27 = vadd.f32 %v722_v44, %v3254_v5  ;;  %v3259_v55 = vunpack.c.l.bf16 %v3258_v17  ;;  %v3260_v30 = vunpack.c.h.bf16 %v3258_v17  ;;  %v3262_v62 = vunpack.c.l.bf16 %v3261_v1 }
  0xc9   :  { %v736_v20 = vadd.f32 %v735_v7, %v3256_v16  ;;  %v749_v10 = vadd.f32 %v748_v56, %v3257_v63  ;;  %v3263_v51 = vunpack.c.h.bf16 %v3261_v1  ;;  %v3265_v14 = vunpack.c.l.bf16 %v3264_v19  ;;  %v3279_v16 = vld [vmem:[#allocation75_spill] sm:$0xff] }
  0xca   :  { %v659_v3 = vadd.f32 %v658_v49, %v3259_v55  ;;  %v672_v33 = vadd.f32 %v671_v24, %v3260_v30  ;;  %v685_v32 = vadd.f32 %v684_v22, %v3262_v62  ;;  %v3266_v44 = vunpack.c.h.bf16 %v3264_v19  ;;  %v3282_v55 = vld [vmem:[#allocation80_spill] sm:$0xff]  ;;  %v3285_v62 = vld [vmem:[#allocation81_spill] sm:$0xff] }
  0xcb   :  { %v698_v36 = vadd.f32 %v697_v2, %v3263_v51  ;;  %v711_v40 = vadd.f32 %v710_v58, %v3265_v14  ;;  %v3268_v7 = vunpack.c.l.bf16 %v3267_v6  ;;  %v3269_v56 = vunpack.c.h.bf16 %v3267_v6  ;;  %v3288_v14 = vld [vmem:[#allocation82_spill] sm:$0xff] }
  0xcc   :  { %v724_v61 = vadd.f32 %v723_v27, %v3266_v44  ;;  %v3271_v49 = vunpack.c.l.bf16 %v3270_v52  ;;  %v3272_v24 = vunpack.c.h.bf16 %v3270_v52  ;;  %v3274_v22 = vunpack.c.l.bf16 %v3273_v45 }
  0xcd   :  { %v737_v29 = vadd.f32 %v736_v20, %v3268_v7  ;;  %v750_v48 = vadd.f32 %v749_v10, %v3269_v56  ;;  %v3275_v2 = vunpack.c.h.bf16 %v3273_v45  ;;  %v3277_v58 = vunpack.c.l.bf16 %v3276_v47 }
  0xce   :  { %v660_v57 = vadd.f32 %v659_v3, %v3271_v49  ;;  %v673_v38 = vadd.f32 %v672_v33, %v3272_v24  ;;  %v686_v4 = vadd.f32 %v685_v32, %v3274_v22  ;;  %v3278_v27 = vunpack.c.h.bf16 %v3276_v47 }
  0xcf   :  { %v699_v18 = vadd.f32 %v698_v36, %v3275_v2  ;;  %v712_v5 = vadd.f32 %v711_v40, %v3277_v58  ;;  %v3280_v20 = vunpack.c.l.bf16 %v3279_v16  ;;  %v3281_v10 = vunpack.c.h.bf16 %v3279_v16 }
  0xd0   :  { %v725_v41 = vadd.f32 %v724_v61, %v3278_v27  ;;  %v3283_v3 = vunpack.c.l.bf16 %v3282_v55  ;;  %v3284_v33 = vunpack.c.h.bf16 %v3282_v55  ;;  %v3286_v32 = vunpack.c.l.bf16 %v3285_v62 }
  0xd1   :  { %v738_v63 = vadd.f32 %v737_v29, %v3280_v20  ;;  %v751_v17 = vadd.f32 %v750_v48, %v3281_v10  ;;  %v3287_v36 = vunpack.c.h.bf16 %v3285_v62  ;;  %v3289_v40 = vunpack.c.l.bf16 %v3288_v14 }
  0xd2   :  { %v661_v30 = vadd.f32 %v660_v57, %v3283_v3  ;;  %v674_v1 = vadd.f32 %v673_v38, %v3284_v33  ;;  %v687_v51 = vadd.f32 %v686_v4, %v3286_v32  ;;  %v3290_v61 = vunpack.c.h.bf16 %v3288_v14 }
  0xd3   :  { %v700_v19 = vadd.f32 %v699_v18, %v3287_v36  ;;  %v713_v44 = vadd.f32 %v712_v5, %v3289_v40  ;;  %v3291_v7 = vunpack.c.l.bf16 %v2016_v60  ;;  %v3292_v56 = vunpack.c.h.bf16 %v2016_v60  ;;  %v3299_v60 = vld [vmem:[#allocation87_spill] sm:$0xff] }
  0xd4   :  { %v726_v6 = vadd.f32 %v725_v41, %v3290_v61  ;;  %v3293_v52 = vunpack.c.l.bf16 %v2034_v23  ;;  %v3294_v57 = vunpack.c.h.bf16 %v2034_v23  ;;  %v3295_v38 = vunpack.c.l.bf16 %v2040_v50 }
  0xd5   :  { %v739_v29 = vadd.f32 %v738_v63, %v3291_v7  ;;  %v752_v48 = vadd.f32 %v751_v17, %v3292_v56  ;;  %v3296_v22 = vunpack.c.h.bf16 %v2040_v50  ;;  %v3297_v2 = vunpack.c.l.bf16 %v2042_v37 }
  0xd6   :  { %v662_v49 = vadd.f32 %v661_v30, %v3293_v52  ;;  %v675_v24 = vadd.f32 %v674_v1, %v3294_v57  ;;  %v688_v45 = vadd.f32 %v687_v51, %v3295_v38  ;;  %v3298_v47 = vunpack.c.h.bf16 %v2042_v37 }
  0xd7   :  { %v701_v4 = vadd.f32 %v700_v19, %v3296_v22  ;;  %v714_v18 = vadd.f32 %v713_v44, %v3297_v2  ;;  %v3300_v5 = vunpack.c.l.bf16 %v3299_v60  ;;  %v3301_v41 = vunpack.c.h.bf16 %v3299_v60 }
  0xd8   :  { %v727_v58 = vadd.f32 %v726_v6, %v3298_v47  ;;  %v663_v23 = vrot.slane %v662_v49, 4  ;;  %v676_v20 = vrot.slane %v675_v24, 4  ;;  %v689_v63 = vrot.slane %v688_v45, 4 }
  0xd9   :  { %v740_v27 = vadd.f32 %v739_v29, %v3300_v5  ;;  %v753_v16 = vadd.f32 %v752_v48, %v3301_v41  ;;  %v702_v10 = vrot.slane %v701_v4, 4  ;;  %v715_v17 = vrot.slane %v714_v18, 4 }
  0xda   :  { %v728_v55 = vrot.slane %v727_v58, 4  ;;  %v664_v30 = vadd.f32 %v663_v23, %v662_v49  ;;  %v677_v33 = vadd.f32 %v676_v20, %v675_v24  ;;  %v690_v1 = vadd.f32 %v689_v63, %v688_v45 }
  0xdb   :  { %v741_v50 = vrot.slane %v740_v27, 4  ;;  %v754_v3 = vrot.slane %v753_v16, 4  ;;  %v703_v62 = vadd.f32 %v702_v10, %v701_v4  ;;  %v716_v37 = vadd.f32 %v715_v17, %v714_v18  ;;  %v3304_v10 = vld [vmem:[#allocation44_spill] sm:$0xff] }
  0xdc   :  { %v729_v32 = vadd.f32 %v728_v55, %v727_v58  ;;  %v665_v19 = vrot.slane %v664_v30, 2  ;;  %v678_v14 = vrot.slane %v677_v33, 2  ;;  %v691_v40 = vrot.slane %v690_v1, 2 }
  0xdd   :  { %v742_v51 = vadd.f32 %v741_v50, %v740_v27  ;;  %v755_v36 = vadd.f32 %v754_v3, %v753_v16  ;;  %v704_v44 = vrot.slane %v703_v62, 2  ;;  %v717_v61 = vrot.slane %v716_v37, 2 }
  0xde   :  { %v730_v6 = vrot.slane %v729_v32, 2  ;;  %v666_v56 = vadd.f32 %v665_v19, %v664_v30  ;;  %v679_v48 = vadd.f32 %v678_v14, %v677_v33  ;;  %v692_v52 = vadd.f32 %v691_v40, %v690_v1  ;;  %v3308_v33 = vld [vmem:[#allocation37_spill] sm:$0xff]  ;;  %v3314_v14 = vld [vmem:[#allocation38_spill] sm:$0xff] }
  0xdf   :  { %v743_v7 = vrot.slane %v742_v51, 2  ;;  %v756_v29 = vrot.slane %v755_v36, 2  ;;  %v705_v57 = vadd.f32 %v704_v44, %v703_v62  ;;  %v718_v49 = vadd.f32 %v717_v61, %v716_v37  ;;  %v3310_v62 = vld [vmem:[#allocation45_spill] sm:$0xff]  ;;  %v3316_v44 = vld [vmem:[#allocation46_spill] sm:$0xff] }
  0xe0   :  { %v731_v24 = vadd.f32 %v730_v6, %v729_v32  ;;  %v667_v22 = vrot.slane %v666_v56, 1  ;;  %v680_v4 = vrot.slane %v679_v48, 1  ;;  %v693_v2 = vrot.slane %v692_v52, 1 }
  0xe1   :  { %v2510_v38 = vadd.f32 %v743_v7, %v742_v51  ;;  %v2512_v45 = vadd.f32 %v756_v29, %v755_v36  ;;  %v706_v18 = vrot.slane %v705_v57, 1  ;;  %v2517_v47 = vadd.f32 %v641_v46, %v2354_v8 }
  0xe2   :  { %v2522_v58 = vadd.f32 %v654_v43, %v2356_v28  ;;  %v719_v60 = vrot.slane %v718_v49, 1  ;;  %v732_v5 = vrot.slane %v731_v24, 1  ;;  %v2524_v27 = vadd.f32 %v667_v22, %v666_v56  ;;  %v3302_v28 = vld [vmem:[#allocation36_spill] sm:$0xff] }
  0xe3   :  { %v2526_v41 = vadd.f32 %v680_v4, %v679_v48  ;;  %v745_v16 = vrot.slane %v2510_v38, 1  ;;  %v758_v23 = vrot.slane %v2512_v45, 1  ;;  %v2530_v20 = vadd.f32 %v693_v2, %v692_v52  ;;  %v3320_v48 = vld [vmem:[#allocation39_spill] sm:$0xff] }
  0xe4   :  { %v2532_v63 = vadd.f32 %v706_v18, %v705_v57  ;;  %v2534_v8 = vadd.f32 %v719_v60, %v718_v49  ;;  %v2536_v46 = vadd.f32 %v732_v5, %v731_v24  ;;  %v3303_v43 = vunpack.c.l.bf16 %v3302_v28  ;;  %v3322_v57 = vld [vmem:[#allocation47_spill] sm:$0xff]  ;;  %v3326_v18 = vld [vmem:[#allocation52_spill] sm:$0xff] }
  0xe5   :  { %v3305_v17 = vunpack.c.l.bf16 %v3304_v10  ;;  %v3306_v50 = vunpack.c.h.bf16 %v3302_v28  ;;  %v3307_v3 = vunpack.c.h.bf16 %v3304_v10  ;;  %v3309_v1 = vunpack.c.l.bf16 %v3308_v33  ;;  %v3329_v10 = vld [vmem:[#allocation53_spill] sm:$0xff] }
  0xe6   :  { %v3311_v37 = vunpack.c.l.bf16 %v3310_v62  ;;  %v3312_v51 = vunpack.c.h.bf16 %v3308_v33  ;;  %v3313_v36 = vunpack.c.h.bf16 %v3310_v62  ;;  %v3315_v40 = vunpack.c.l.bf16 %v3314_v14 }
  0xe7   :  { %v760_v55 = vadd.f32 %v3305_v17, %v3303_v43  ;;  %v773_v30 = vadd.f32 %v3307_v3, %v3306_v50  ;;  %v3317_v61 = vunpack.c.l.bf16 %v3316_v44  ;;  %v3318_v7 = vunpack.c.h.bf16 %v3314_v14  ;;  %v3335_v14 = vld [vmem:[#allocation55_spill] sm:$0xff] }
  0xe8   :  { %v786_v32 = vadd.f32 %v3311_v37, %v3309_v1  ;;  %v799_v19 = vadd.f32 %v3313_v36, %v3312_v51  ;;  %v3319_v29 = vunpack.c.h.bf16 %v3316_v44  ;;  %v3321_v52 = vunpack.c.l.bf16 %v3320_v48  ;;  %v3332_v1 = vld [vmem:[#allocation54_spill] sm:$0xff] }
  0xe9   :  { %v812_v6 = vadd.f32 %v3317_v61, %v3315_v40  ;;  %v3323_v49 = vunpack.c.l.bf16 %v3322_v57  ;;  %v3324_v22 = vunpack.c.h.bf16 %v3320_v48  ;;  %v3325_v4 = vunpack.c.h.bf16 %v3322_v57 }
  0xea   :  { %v825_v56 = vadd.f32 %v3319_v29, %v3318_v7  ;;  %v3327_v60 = vunpack.c.l.bf16 %v3326_v18  ;;  %v3328_v28 = vunpack.c.h.bf16 %v3326_v18  ;;  %v3330_v17 = vunpack.c.l.bf16 %v3329_v10  ;;  %v3338_v7 = vld [vmem:[#allocation60_spill] sm:$0xff] }
  0xeb   :  { %v838_v24 = vadd.f32 %v3323_v49, %v3321_v52  ;;  %v851_v2 = vadd.f32 %v3325_v4, %v3324_v22  ;;  %v3331_v3 = vunpack.c.h.bf16 %v3329_v10  ;;  %v3333_v62 = vunpack.c.l.bf16 %v3332_v1  ;;  %v3341_v52 = vld [vmem:[#allocation61_spill] sm:$0xff]  ;;  %v3344_v22 = vld [vmem:[#allocation62_spill] sm:$0xff] }
  0xec   :  { %v761_v5 = vadd.f32 %v760_v55, %v3327_v60  ;;  %v774_v43 = vadd.f32 %v773_v30, %v3328_v28  ;;  %v787_v50 = vadd.f32 %v786_v32, %v3330_v17  ;;  %v3334_v51 = vunpack.c.h.bf16 %v3332_v1  ;;  %v3347_v60 = vld [vmem:[#allocation63_spill] sm:$0xff]  ;;  %v3350_v17 = vld [vmem:[#allocation68_spill] sm:$0xff] }
  0xed   :  { %v800_v33 = vadd.f32 %v799_v19, %v3331_v3  ;;  %v813_v37 = vadd.f32 %v812_v6, %v3333_v62  ;;  %v3336_v40 = vunpack.c.l.bf16 %v3335_v14  ;;  %v3337_v55 = vunpack.c.h.bf16 %v3335_v14  ;;  %v3353_v62 = vld [vmem:[#allocation69_spill] sm:$0xff] }
  0xee   :  { %v826_v36 = vadd.f32 %v825_v56, %v3334_v51  ;;  %v3339_v30 = vunpack.c.l.bf16 %v3338_v7  ;;  %v3340_v32 = vunpack.c.h.bf16 %v3338_v7  ;;  %v3342_v19 = vunpack.c.l.bf16 %v3341_v52 }
  0xef   :  { %v839_v44 = vadd.f32 %v838_v24, %v3336_v40  ;;  %v852_v61 = vadd.f32 %v851_v2, %v3337_v55  ;;  %v3343_v6 = vunpack.c.h.bf16 %v3341_v52  ;;  %v3345_v56 = vunpack.c.l.bf16 %v3344_v22  ;;  %v3356_v40 = vld [vmem:[#allocation70_spill] sm:$0xff] }
  0xf0   :  { %v762_v29 = vadd.f32 %v761_v5, %v3339_v30  ;;  %v775_v48 = vadd.f32 %v774_v43, %v3340_v32  ;;  %v788_v57 = vadd.f32 %v787_v50, %v3342_v19  ;;  %v3346_v24 = vunpack.c.h.bf16 %v3344_v22  ;;  %v3359_v30 = vld [vmem:[#allocation71_spill] sm:$0xff]  ;;  %v3362_v19 = vld [vmem:[#allocation76_spill] sm:$0xff] }
  0xf1   :  { %v801_v49 = vadd.f32 %v800_v33, %v3343_v6  ;;  %v814_v4 = vadd.f32 %v813_v37, %v3345_v56  ;;  %v3348_v2 = vunpack.c.l.bf16 %v3347_v60  ;;  %v3349_v5 = vunpack.c.h.bf16 %v3347_v60  ;;  %v3365_v56 = vld [vmem:[#allocation77_spill] sm:$0xff] }
  0xf2   :  { %v827_v18 = vadd.f32 %v826_v36, %v3346_v24  ;;  %v3351_v43 = vunpack.c.l.bf16 %v3350_v17  ;;  %v3352_v50 = vunpack.c.h.bf16 %v3350_v17  ;;  %v3354_v33 = vunpack.c.l.bf16 %v3353_v62 }
  0xf3   :  { %v840_v28 = vadd.f32 %v839_v44, %v3348_v2  ;;  %v853_v10 = vadd.f32 %v852_v61, %v3349_v5  ;;  %v3355_v37 = vunpack.c.h.bf16 %v3353_v62  ;;  %v3357_v36 = vunpack.c.l.bf16 %v3356_v40  ;;  %v3368_v2 = vld [vmem:[#allocation78_spill] sm:$0xff] }
  0xf4   :  { %v763_v3 = vadd.f32 %v762_v29, %v3351_v43  ;;  %v776_v1 = vadd.f32 %v775_v48, %v3352_v50  ;;  %v789_v51 = vadd.f32 %v788_v57, %v3354_v33  ;;  %v3358_v44 = vunpack.c.h.bf16 %v3356_v40  ;;  %v3371_v43 = vld [vmem:[#allocation79_spill] sm:$0xff] }
  0xf5   :  { %v802_v14 = vadd.f32 %v801_v49, %v3355_v37  ;;  %v815_v55 = vadd.f32 %v814_v4, %v3357_v36  ;;  %v3360_v61 = vunpack.c.l.bf16 %v3359_v30  ;;  %v3361_v29 = vunpack.c.h.bf16 %v3359_v30  ;;  %v3374_v33 = vld [vmem:[#allocation83_spill] sm:$0xff]  ;;  %v3377_v36 = vld [vmem:[#allocation84_spill] sm:$0xff] }
  0xf6   :  { %v828_v7 = vadd.f32 %v827_v18, %v3358_v44  ;;  %v3363_v48 = vunpack.c.l.bf16 %v3362_v19  ;;  %v3364_v57 = vunpack.c.h.bf16 %v3362_v19  ;;  %v3366_v49 = vunpack.c.l.bf16 %v3365_v56 }
  0xf7   :  { %v841_v32 = vadd.f32 %v840_v28, %v3360_v61  ;;  %v854_v52 = vadd.f32 %v853_v10, %v3361_v29  ;;  %v3367_v4 = vunpack.c.h.bf16 %v3365_v56  ;;  %v3369_v18 = vunpack.c.l.bf16 %v3368_v2  ;;  %v3380_v61 = vld [vmem:[#allocation85_spill] sm:$0xff] }
  0xf8   :  { %v764_v6 = vadd.f32 %v763_v3, %v3363_v48  ;;  %v777_v22 = vadd.f32 %v776_v1, %v3364_v57  ;;  %v790_v24 = vadd.f32 %v789_v51, %v3366_v49  ;;  %v3370_v28 = vunpack.c.h.bf16 %v3368_v2  ;;  %v3383_v48 = vld [vmem:[#allocation86_spill] sm:$0xff]  ;;  %v3386_v49 = vld [vmem:[#allocation88_spill] sm:$0xff] }
  0xf9   :  { %v803_v60 = vadd.f32 %v802_v14, %v3367_v4  ;;  %v816_v5 = vadd.f32 %v815_v55, %v3369_v18  ;;  %v3372_v10 = vunpack.c.l.bf16 %v3371_v43  ;;  %v3373_v3 = vunpack.c.h.bf16 %v3371_v43  ;;  %v3389_v18 = vld [vmem:[#allocation89_spill] sm:$0xff] }
  0xfa   :  { %v829_v17 = vadd.f32 %v828_v7, %v3370_v28  ;;  %v3375_v1 = vunpack.c.l.bf16 %v3374_v33  ;;  %v3376_v51 = vunpack.c.h.bf16 %v3374_v33  ;;  %v3378_v14 = vunpack.c.l.bf16 %v3377_v36 }
  0xfb   :  { %v842_v50 = vadd.f32 %v841_v32, %v3372_v10  ;;  %v855_v62 = vadd.f32 %v854_v52, %v3373_v3  ;;  %v3379_v55 = vunpack.c.h.bf16 %v3377_v36  ;;  %v3381_v7 = vunpack.c.l.bf16 %v3380_v61  ;;  %v3392_v10 = vld [vmem:[#allocation90_spill] sm:$0xff] }
  0xfc   :  { %v765_v37 = vadd.f32 %v764_v6, %v3375_v1  ;;  %v778_v40 = vadd.f32 %v777_v22, %v3376_v51  ;;  %v791_v44 = vadd.f32 %v790_v24, %v3378_v14  ;;  %v3382_v32 = vunpack.c.h.bf16 %v3380_v61 }
  0xfd   :  { %v804_v30 = vadd.f32 %v803_v60, %v3379_v55  ;;  %v817_v29 = vadd.f32 %v816_v5, %v3381_v7  ;;  %v3384_v52 = vunpack.c.l.bf16 %v3383_v48  ;;  %v3385_v6 = vunpack.c.h.bf16 %v3383_v48 }
  0xfe   :  { %v830_v19 = vadd.f32 %v829_v17, %v3382_v32  ;;  %v3387_v22 = vunpack.c.l.bf16 %v3386_v49  ;;  %v3388_v24 = vunpack.c.h.bf16 %v3386_v49  ;;  %v3390_v60 = vunpack.c.l.bf16 %v3389_v18 }
  0xff   :  { %v843_v57 = vadd.f32 %v842_v50, %v3384_v52  ;;  %v856_v56 = vadd.f32 %v855_v62, %v3385_v6  ;;  %v3391_v5 = vunpack.c.h.bf16 %v3389_v18  ;;  %v3393_v17 = vunpack.c.l.bf16 %v3392_v10 }
 0x100   :  { %v766_v4 = vadd.f32 %v765_v37, %v3387_v22  ;;  %v779_v2 = vadd.f32 %v778_v40, %v3388_v24  ;;  %v792_v28 = vadd.f32 %v791_v44, %v3390_v60  ;;  %v3394_v50 = vunpack.c.h.bf16 %v3392_v10 }
 0x101   :  { %v805_v43 = vadd.f32 %v804_v30, %v3391_v5  ;;  %v818_v3 = vadd.f32 %v817_v29, %v3393_v17  ;;  %v844_v62 = vadd.f32 %v843_v57, %v446_v13  ;;  %v857_v1 = vadd.f32 %v856_v56, %v447_v15 }
 0x102   :  { %v831_v33 = vadd.f32 %v830_v19, %v3394_v50  ;;  %v767_v37 = vrot.slane %v766_v4, 4  ;;  %v780_v51 = vrot.slane %v779_v2, 4  ;;  %v793_v40 = vrot.slane %v792_v28, 4 }
 0x103   :  { %v806_v36 = vrot.slane %v805_v43, 4  ;;  %v819_v14 = vrot.slane %v818_v3, 4  ;;  %v845_v55 = vrot.slane %v844_v62, 4  ;;  %v858_v30 = vrot.slane %v857_v1, 4 }
 0x104   :  { %v832_v44 = vrot.slane %v831_v33, 4  ;;  %v768_v61 = vadd.f32 %v767_v37, %v766_v4  ;;  %v781_v7 = vadd.f32 %v780_v51, %v779_v2  ;;  %v794_v29 = vadd.f32 %v793_v40, %v792_v28 }
 0x105   :  { %v807_v32 = vadd.f32 %v806_v36, %v805_v43  ;;  %v820_v48 = vadd.f32 %v819_v14, %v818_v3  ;;  %v846_v52 = vadd.f32 %v845_v55, %v844_v62  ;;  %v859_v6 = vadd.f32 %v858_v30, %v857_v1 }
 0x106   :  { %v833_v19 = vadd.f32 %v832_v44, %v831_v33  ;;  %v769_v13 = vrot.slane %v768_v61, 2  ;;  %v782_v57 = vrot.slane %v781_v7, 2  ;;  %v795_v0 = vrot.slane %v794_v29, 2 }
 0x107   :  { %v808_v15 = vrot.slane %v807_v32, 2  ;;  %v821_v56 = vrot.slane %v820_v48, 2  ;;  %v847_v22 = vrot.slane %v846_v52, 2  ;;  %v860_v24 = vrot.slane %v859_v6, 2 }
 0x108   :  { %v834_v49 = vrot.slane %v833_v19, 2  ;;  %v770_v18 = vadd.f32 %v769_v13, %v768_v61  ;;  %v783_v60 = vadd.f32 %v782_v57, %v781_v7  ;;  %v796_v5 = vadd.f32 %v795_v0, %v794_v29 }
 0x109   :  { %v809_v10 = vadd.f32 %v808_v15, %v807_v32  ;;  %v822_v4 = vadd.f32 %v821_v56, %v820_v48  ;;  %v848_v28 = vadd.f32 %v847_v22, %v846_v52  ;;  %v861_v43 = vadd.f32 %v860_v24, %v859_v6  ;;  %v2712_v56 = vld [vmem:[#allocation6] sm:$0xff] }
 0x10a   :  { %v835_v2 = vadd.f32 %v834_v49, %v833_v19  ;;  %v771_v17 = vrot.slane %v770_v18, 1  ;;  %v784_v3 = vrot.slane %v783_v60, 1  ;;  %v797_v50 = vrot.slane %v796_v5, 1 }
 0x10b   :  { %v810_v33 = vrot.slane %v809_v10, 1  ;;  %v823_v62 = vrot.slane %v822_v4, 1  ;;  %v849_v37 = vrot.slane %v848_v28, 1  ;;  %v862_v51 = vrot.slane %v861_v43, 1 }
 0x10c   :  { %v836_v1 = vrot.slane %v835_v2, 1  ;;  %v746_v40 = vadd.f32 %v745_v16, %v2510_v38  ;;  %v759_v36 = vadd.f32 %v758_v23, %v2512_v45  ;;  %v772_v14 = vadd.f32 %v771_v17, %v770_v18 }
 0x10d   :  { %v785_v44 = vadd.f32 %v784_v3, %v783_v60  ;;  %v798_v55 = vadd.f32 %v797_v50, %v796_v5  ;;  %v811_v30 = vadd.f32 %v810_v33, %v809_v10  ;;  %v824_v61 = vadd.f32 %v823_v62, %v822_v4 }
 0x10e   :  { %v837_v7 = vadd.f32 %v836_v1, %v835_v2  ;;  %v850_v29 = vadd.f32 %v849_v37, %v848_v28  ;;  %v863_v32 = vadd.f32 %v862_v51, %v861_v43  ;;  %v901_v48 = vlaneseq }
 0x10f   :  { %v896_v19 = vcombine.low %v2212_v25, %v2214_v34  ;;  %v897_v52 = vcombine.low %v2218_v35, %v2220_v54  ;;  %v1503_v38 = vmov 1983009808   ;;  %v913_v45 = vcombine.low %v2222_v42, %v2224_v39 }
 0x110   :  { %v899_v16 = vunpack.c.l.s4 %v1503_v38  ;;  %v2678_v23 = vshrl.u32 %v901_v48, 7  ;;  %v914_v6 = vcombine.low %v2361_v9, %v2366_v21  ;;  %v930_v13 = vcombine.low %v2368_v12, %v2370_v26 }
 0x111   :  { %v931_v57 = vcombine.low %v2374_v31, %v2376_v59  ;;  %v947_v34 = vcombine.low %v2378_v53, %v2380_v11  ;;  %v948_v35 = vcombine.low %v2517_v47, %v2522_v58  ;;  %v964_v54 = vcombine.low %v2524_v27, %v2526_v41 }
 0x112   :  { %v900_v25 = vunpack.c.0.s8 %v899_v16  ;;  %v965_v42 = vcombine.low %v2530_v20, %v2532_v63  ;;  %v981_v39 = vcombine.low %v2534_v8, %v2536_v46  ;;  %v982_v9 = vcombine.low %v746_v40, %v759_v36 }
 0x113   :  { %v998_v21 = vcombine.low %v772_v14, %v785_v44  ;;  %v999_v26 = vcombine.low %v798_v55, %v811_v30  ;;  %v1015_v31 = vcombine.low %v824_v61, %v837_v7  ;;  %v1016_v59 = vcombine.low %v850_v29, %v863_v32 }
 0x114   :  { %v2697_v12 = vsub.s32 %v900_v25, %v2678_v23  ;;  %v2700_v53 = vsub.s32 0, %v2678_v23  ;;  %v2715_v49 = vsub.s32 1, %v2678_v23  ;;  %v2726_v62 = vsub.s32 2, %v2678_v23 }
 0x115   :  { %v2729_v1 = vsub.s32 3, %v2678_v23  ;;  %v2734_v36 = vsub.s32 4, %v2678_v23  ;;  %v2740_v30 = vsub.s32 5, %v2678_v23 }
 0x116   :  { %v904_v11 = vrot.slane %v896_v19, %v2697_v12  ;;  %v911_v47 = vrot.slane %v897_v52, %v2697_v12  ;;  %v921_v58 = vrot.slane %v913_v45, %v2697_v12  ;;  %v928_v27 = vrot.slane %v914_v6, %v2697_v12 }
 0x117   :  { %v938_v41 = vrot.slane %v930_v13, %v2697_v12  ;;  %v945_v20 = vrot.slane %v931_v57, %v2697_v12  ;;  %v955_v63 = vrot.slane %v947_v34, %v2697_v12  ;;  %v962_v8 = vrot.slane %v948_v35, %v2697_v12  ;;  %v1090_v57 = vld [vmem:[#allocation6 + $0x8] sm:$0xff] }
 0x118   :  { %v912_v46 = vcombine.low %v904_v11, %v911_v47  ;;  %v972_v0 = vrot.slane %v964_v54, %v2697_v12  ;;  %v979_v15 = vrot.slane %v965_v42, %v2697_v12  ;;  %v929_v22 = vcombine.low %v921_v58, %v928_v27 }
 0x119   :  { %v946_v24 = vcombine.low %v938_v41, %v945_v20  ;;  %v989_v18 = vrot.slane %v981_v39, %v2697_v12  ;;  %v996_v60 = vrot.slane %v982_v9, %v2697_v12  ;;  %v1006_v10 = vrot.slane %v998_v21, %v2697_v12 }
 0x11a   :  { %v980_v5 = vcombine.low %v972_v0, %v979_v15  ;;  %v1013_v4 = vrot.slane %v999_v26, %v2697_v12  ;;  %v1023_v2 = vrot.slane %v1015_v31, %v2697_v12  ;;  %v963_v28 = vcombine.low %v955_v63, %v962_v8 }
 0x11b   :  { %v997_v43 = vcombine.low %v989_v18, %v996_v60  ;;  %v1030_v17 = vrot.slane %v1016_v59, %v2697_v12  ;;  %v1096_v3 = vrot.slane %v2712_v56, %v2700_v53  ;;  %v1100_v40 = vrot.slane %v2712_v56, %v2715_v49 }
 0x11c   :  { %v1014_v50 = vcombine.low %v1006_v10, %v1013_v4  ;;  %v1036_v33 = vrot.slane %v980_v5, 7  ;;  %v1104_v55 = vrot.slane %v2712_v56, %v2726_v62  ;;  %v1108_v32 = vrot.slane %v2712_v56, %v2729_v1 }
 0x11d   :  { %v1031_v37 = vcombine.low %v1023_v2, %v1030_v17  ;;  %v1047_v51 = vrot.slane %v997_v43, 7  ;;  %v1112_v38 = vrot.slane %v2712_v56, %v2734_v36  ;;  %v1116_v54 = vrot.slane %v2712_v56, %v2740_v30 }
 0x11e   :  { %v1038_v14 = vsel %vm1037_vm0, %v1036_v33, %v912_v46  ;;  %v1054_v44 = vrot.slane %v1014_v50, 7  ;;  %v2763_v21 = vsub.s32 6, %v2678_v23  ;;  %v2767_v59 = vsub.s32 7, %v2678_v23 }
 0x11f   :  { %v1040_v61 = vsel %vm1039_vm1, %v1036_v33, %v1038_v14  ;;  %v1048_v7 = vsel %vm1037_vm0, %v1047_v51, %v929_v22  ;;  %v1061_v29 = vrot.slane %v1031_v37, 7  ;;  %v1128_v11 = vrot.slane %v1090_v57, %v2700_v53 }
 0x120   :  { %v1042_v48 = vsel %vm1041_vm2, %v1036_v33, %v1040_v61  ;;  %v1049_v19 = vsel %vm1039_vm1, %v1047_v51, %v1048_v7  ;;  %v1055_v52 = vsel %vm1037_vm0, %v1054_v44, %v946_v24  ;;  %v1120_v58 = vrot.slane %v2712_v56, %v2763_v21 }
 0x121   :  { %v1044_v16 = vsel %vm1043_vm3, %v1036_v33, %v1042_v48  ;;  %v1050_v45 = vsel %vm1041_vm2, %v1047_v51, %v1049_v19  ;;  %v1056_v6 = vsel %vm1039_vm1, %v1054_v44, %v1055_v52  ;;  %v1062_v13 = vsel %vm1037_vm0, %v1061_v29, %v963_v28  ;;  %v1233_v28 = vld [vmem:[#allocation8] sm:$0xff] }
 0x122   :  { %v1051_v25 = vsel %vm1043_vm3, %v1047_v51, %v1050_v45  ;;  %v1057_v34 = vsel %vm1041_vm2, %v1054_v44, %v1056_v6  ;;  %v1063_v35 = vsel %vm1039_vm1, %v1061_v29, %v1062_v13  ;;  %v1085_v9 = vmul.f32 0.015625, %v1044_v16 }
 0x123   :  { %v1058_v42 = vsel %vm1043_vm3, %v1054_v44, %v1057_v34  ;;  %v1064_v39 = vsel %vm1041_vm2, %v1061_v29, %v1063_v35  ;;  %v1086_v31 = vmul.f32 0.015625, %v1051_v25  ;;  %v1132_v27 = vrot.slane %v1090_v57, %v2715_v49 }
 0x124   :  { %v1065_v26 = vsel %vm1043_vm3, %v1061_v29, %v1064_v39  ;;  %v1087_v47 = vmul.f32 0.015625, %v1058_v42  ;;  %v1136_v41 = vrot.slane %v1090_v57, %v2726_v62  ;;  %v1124_v20 = vrot.slane %v2712_v56, %v2767_v59 }
 0x125   :  { %v1140_v63 = vrot.slane %v1090_v57, %v2729_v1  ;;  %v1144_v8 = vrot.slane %v1090_v57, %v2734_v36  ;;  %v1148_v23 = vrot.slane %v1090_v57, %v2740_v30  ;;  %v1152_v46 = vrot.slane %v1090_v57, %v2763_v21 }
 0x126   :  { %v1156_v0 = vrot.slane %v1090_v57, %v2767_v59  ;;  %v1157_v15 = vcombine.low %v1096_v3, %v1100_v40  ;;  %v1158_v22 = vcombine.low %v1104_v55, %v1108_v32  ;;  %v1174_v24 = vcombine.low %v1112_v38, %v1116_v54  ;;  %v1234_v55 = vld [vmem:[#allocation8 + $0x8] sm:$0xff] }
 0x127   :  { %v1175_v18 = vcombine.low %v1120_v58, %v1124_v20  ;;  %v1191_v60 = vcombine.low %v1128_v11, %v1132_v27  ;;  %v1192_v5 = vcombine.low %v1136_v41, %v1140_v63  ;;  %v1208_v4 = vcombine.low %v1144_v8, %v1148_v23 }
 0x128   :  { %v1165_v10 = vrot.slane %v1157_v15, %v2697_v12  ;;  %v1172_v56 = vrot.slane %v1158_v22, %v2697_v12  ;;  %v1209_v2 = vcombine.low %v1152_v46, %v1156_v0  ;;  %v1182_v43 = vrot.slane %v1174_v24, %v2697_v12 }
 0x129   :  { %v1189_v17 = vrot.slane %v1175_v18, %v2697_v12  ;;  %v1199_v50 = vrot.slane %v1191_v60, %v2697_v12  ;;  %v1206_v3 = vrot.slane %v1192_v5, %v2697_v12  ;;  %v1088_v33 = vmul.f32 0.015625, %v1065_v26 }
 0x12a   :  { %v1173_v37 = vcombine.low %v1165_v10, %v1172_v56  ;;  %v1216_v51 = vrot.slane %v1208_v4, %v2697_v12  ;;  %v1223_v40 = vrot.slane %v1209_v2, %v2697_v12  ;;  %v1240_v61 = vrot.slane %v1233_v28, %v2700_v53 }
 0x12b   :  { %v1190_v14 = vcombine.low %v1182_v43, %v1189_v17  ;;  %v1207_v44 = vcombine.low %v1199_v50, %v1206_v3  ;;  %v1244_v7 = vrot.slane %v1233_v28, %v2715_v49  ;;  %v1248_v48 = vrot.slane %v1233_v28, %v2726_v62 }
 0x12c   :  { %v1224_v29 = vcombine.low %v1216_v51, %v1223_v40  ;;  %v1229_v32 = vmul.f32 %v1173_v37, %v1085_v9  ;;  %v1252_v19 = vrot.slane %v1233_v28, %v2729_v1  ;;  %v1256_v38 = vrot.slane %v1233_v28, %v2734_v36 }
 0x12d   :  { %v1230_v52 = vmul.f32 %v1190_v14, %v1086_v31  ;;  %v1260_v16 = vrot.slane %v1233_v28, %v2740_v30  ;;  %v1264_v45 = vrot.slane %v1233_v28, %v2763_v21  ;;  %v1231_v6 = vmul.f32 %v1207_v44, %v1087_v47 }
 0x12e   :  { %v1268_v13 = vrot.slane %v1233_v28, %v2767_v59  ;;  %v1272_v57 = vrot.slane %v1234_v55, %v2700_v53  ;;  %v1276_v25 = vrot.slane %v1234_v55, %v2715_v49  ;;  %v1280_v34 = vrot.slane %v1234_v55, %v2726_v62 }
 0x12f   :  { %v1284_v35 = vrot.slane %v1234_v55, %v2729_v1  ;;  %v1288_v54 = vrot.slane %v1234_v55, %v2734_v36  ;;  %v1292_v42 = vrot.slane %v1234_v55, %v2740_v30  ;;  %v1296_v39 = vrot.slane %v1234_v55, %v2763_v21 }
 0x130   :  { %v1300_v9 = vrot.slane %v1234_v55, %v2767_v59  ;;  %v1301_v26 = vcombine.low %v1240_v61, %v1244_v7  ;;  %v1302_v31 = vcombine.low %v1248_v48, %v1252_v19  ;;  %v1318_v11 = vcombine.low %v1256_v38, %v1260_v16 }
 0x131   :  { %v1319_v47 = vcombine.low %v1264_v45, %v1268_v13  ;;  %v1335_v58 = vcombine.low %v1272_v57, %v1276_v25  ;;  %v1336_v53 = vcombine.low %v1280_v34, %v1284_v35  ;;  %v1352_v27 = vcombine.low %v1288_v54, %v1292_v42 }
 0x132   :  { %v1309_v49 = vrot.slane %v1301_v26, %v2697_v12  ;;  %v1316_v62 = vrot.slane %v1302_v31, %v2697_v12  ;;  %v1353_v1 = vcombine.low %v1296_v39, %v1300_v9  ;;  %v1326_v36 = vrot.slane %v1318_v11, %v2697_v12 }
 0x133   :  { %v1333_v30 = vrot.slane %v1319_v47, %v2697_v12  ;;  %v1343_v21 = vrot.slane %v1335_v58, %v2697_v12  ;;  %v1350_v59 = vrot.slane %v1336_v53, %v2697_v12  ;;  %v1232_v41 = vmul.f32 %v1224_v29, %v1088_v33 }
 0x134   :  { %v1317_v20 = vcombine.low %v1309_v49, %v1316_v62  ;;  %v1360_v63 = vrot.slane %v1352_v27, %v2697_v12  ;;  %v1367_v8 = vrot.slane %v1353_v1, %v2697_v12 }
 0x135   :  { %v1334_v23 = vcombine.low %v1326_v36, %v1333_v30  ;;  %v1351_v46 = vcombine.low %v1343_v21, %v1350_v59 }
 0x136   :  { %v1368_v0 = vcombine.low %v1360_v63, %v1367_v8  ;;  %v1373_v15 = vadd.f32 %v1317_v20, %v1229_v32 }
 0x137   :  { %v1374_v22 = vadd.f32 %v1334_v23, %v1230_v52  ;;  %v1375_v24 = vadd.f32 %v1351_v46, %v1231_v6 }
 0x138   :  { %v1376_v18 = vadd.f32 %v1368_v0, %v1232_v41  ;;  %1377 = vst [vmem:[#allocation9] sm:$0xff] %v1373_v15 }
 0x139   :  { %1378 = vst [vmem:[#allocation9 + $0x8] sm:$0xff] %v1374_v22  ;;  %1379 = vst [vmem:[#allocation9 + $0x10] sm:$0xff] %v1375_v24 }
 0x13a   :  { %1380 = vst [vmem:[#allocation9 + $0x18] sm:$0xff] %v1376_v18 }
 0x13b   :  { %1481 = shalt.err (!%p1478_p0)
}
 0x13c   :  { %s1482_s25 = scalar_lea.hbm %s2828_s3, 512 }
 0x13d   :  { %p1483_p1 = scmp.ne.s32.totalorder %s2828_s3, %s1482_s25  ;;  %p1486_p2 = scmp.lt.u32.totalorder %s1482_s25, %s2828_s3 }
 0x13f   :  { %p1488_p3 = pnand %p1486_p2, %p1483_p1 }
 0x141   :  { %1491 = shalt.err (!%p1488_p3)
}
 0x142   :  { %1390 = dma.vmem_to_hbm [thread:$0]  %s1388_s21, 512, %s2828_s3, [#allocation5]  }
 0x143   :  { %1496 = dma.done.wait [#allocation5], 512  }
 0x144   :  { %1497 = vsyncadd [#allocation5], 4294966784 }
 0x145   :  { %1394 = vsyncpa [#allocation4], 1 }
 0x146   :  { %1395 = vsyncpa [#allocation7], 1 }
 0x147   :  { %1396 = vsyncpa [#allocation5], 1 }

</bundles_post_ra>
